<compile_context>
chip_gen: v7x
topology: tpu7x:2x2x1
jax: 0.10.0
libtpu: 0.0.40
codegen_flags: <defaults>
</compile_context>

<pallas_src>
import jax
import jax.numpy as jnp
from jax.experimental import pallas as pl
from jax.experimental.pallas import tpu as pltpu


# ----------------------------------------------------------------------------
# Fused Pallas kernel (all layers + FC head)
# ----------------------------------------------------------------------------

def _make_fused_lstm_kernel(num_layers, T, B_pad, H):
    """Build the fused kernel for fixed (num_layers, T, B_pad, H)."""

    def kernel(*refs):
        # inputs..., output, scratches
        x_ref = refs[0]                                  # (T*B_pad, Din0)
        lrefs = refs[1:1 + 3 * num_layers]               # per layer: wihT, whhT, bias
        fcw_ref = refs[1 + 3 * num_layers]               # (1, H)
        fcb_ref = refs[2 + 3 * num_layers]               # (1, 1)
        out_ref = refs[3 + 3 * num_layers]               # (T*B_pad, 1)
        xp_scr = refs[4 + 3 * num_layers]                # (T*B_pad, 4H) scratch
        hs_scr = refs[5 + 3 * num_layers]                # (T*B_pad, H)  scratch

        seq2d = x_ref[...]                               # layer input (T*B_pad, Din_l)

        for layer in range(num_layers):
            wihT = lrefs[3 * layer][...]                 # (Din_l, 4H)
            whhT = lrefs[3 * layer + 1][...]             # (H, 4H)
            bias = lrefs[3 * layer + 2][...]             # (1, 4H) = b_ih + b_hh

            # Hoisted input projection + folded bias: one big MXU matmul for
            # all T timesteps.  Only h @ W_hh^T stays inside the recurrence.
            xp_scr[...] = (
                jnp.dot(seq2d, wihT, preferred_element_type=jnp.float32) + bias)

            h = jnp.zeros((B_pad, H), jnp.float32)
            c = jnp.zeros((B_pad, H), jnp.float32)
            for t in range(T):                           # static unroll, T small
                row = t * B_pad                          # compile-time, 8-aligned
                gates = xp_scr[pl.ds(row, B_pad), :] + jnp.dot(
                    h, whhT, preferred_element_type=jnp.float32)   # (B_pad, 4H)
                # Full-vreg nonlinearities, gates sliced afterwards (i, f, g, o).
                sg = jax.nn.sigmoid(gates)
                th = jnp.tanh(gates)
                i_g = sg[:, 0 * H:1 * H]
                f_g = sg[:, 1 * H:2 * H]
                g_g = th[:, 2 * H:3 * H]
                o_g = sg[:, 3 * H:4 * H]
                c = f_g * c + i_g * g_g
                h = o_g * jnp.tanh(c)
                hs_scr[pl.ds(row, B_pad), :] = h         # hidden seq stays in VMEM

            seq2d = hs_scr[...]                          # input to next layer / FC

        # Fused FC head (H -> 1): VPU multiply + lane reduction over the whole
        # resident hidden sequence (avoids a degenerate N=1 MXU matmul).
        fc_row = fcw_ref[...]                            # (1, H)
        out_ref[...] = (
            jnp.sum(seq2d * fc_row, axis=1, keepdims=True)
            + fcb_ref[...]).astype(out_ref.dtype)

    return kernel


# ----------------------------------------------------------------------------
# Wrapper
# ----------------------------------------------------------------------------

def lstm_model_forward(x_btd, layer_params, fc_w, fc_b):
    """Full model: multi-layer LSTM (batch_first) + Linear(hidden, 1).

    x_btd        : (B, T, input_size)
    layer_params : list of (weight_ih (4H,Din), weight_hh (4H,H),
                            bias_ih (4H,), bias_hh (4H,))   [PyTorch layout]
    fc_w, fc_b   : (1, H), (1,)
    returns      : (B, T, 1)
    """
    B, T, Din = x_btd.shape
    H = layer_params[0][1].shape[1]
    num_layers = len(layer_params)
    B_pad = max(8, ((B + 7) // 8) * 8)   # pad batch to the f32 sublane granule

    # time-major, batch-padded, flattened: row index = t*B_pad + b
    x_p = jnp.zeros((B_pad, T, Din), jnp.float32).at[:B].set(
        x_btd.astype(jnp.float32))
    x2d = jnp.transpose(x_p, (1, 0, 2)).reshape(T * B_pad, Din)

    flat_inputs = [x2d]
    in_specs = [pl.BlockSpec((T * B_pad, Din), lambda i: (0, 0))]
    for (w_ih, w_hh, b_ih, b_hh) in layer_params:
        wihT = jnp.transpose(w_ih).astype(jnp.float32)            # (Din_l, 4H)
        whhT = jnp.transpose(w_hh).astype(jnp.float32)            # (H, 4H)
        bias = (b_ih + b_hh).reshape(1, -1).astype(jnp.float32)   # folded bias
        flat_inputs += [wihT, whhT, bias]
        in_specs += [
            pl.BlockSpec(wihT.shape, lambda i: (0, 0)),
            pl.BlockSpec(whhT.shape, lambda i: (0, 0)),
            pl.BlockSpec(bias.shape, lambda i: (0, 0)),
        ]
    fc_w2 = fc_w.reshape(1, H).astype(jnp.float32)                # (1, H)
    fc_b2 = fc_b.reshape(1, 1).astype(jnp.float32)                # (1, 1)
    flat_inputs += [fc_w2, fc_b2]
    in_specs += [pl.BlockSpec(fc_w2.shape, lambda i: (0, 0)),
                 pl.BlockSpec(fc_b2.shape, lambda i: (0, 0))]

    kernel = _make_fused_lstm_kernel(num_layers, T, B_pad, H)
    y = pl.pallas_call(
        kernel,
        out_shape=jax.ShapeDtypeStruct((T * B_pad, 1), jnp.float32),
        grid_spec=pltpu.PrefetchScalarGridSpec(
            num_scalar_prefetch=0,
            grid=(1,),
            in_specs=in_specs,
            out_specs=pl.BlockSpec((T * B_pad, 1), lambda i: (0, 0)),
            scratch_shapes=[
                pltpu.VMEM((T * B_pad, 4 * H), jnp.float32),  # hoisted x-projection
                pltpu.VMEM((T * B_pad, H), jnp.float32),      # hidden sequence
            ],
        ),
        compiler_params=pltpu.CompilerParams(
            dimension_semantics=("arbitrary",)),
    )(*flat_inputs)

    # TODO(synk): inter-layer dropout omitted (drop_out=0.0 / eval mode).
    y = y.reshape(T, B_pad, 1)[:, :B, :]                      # (T, B, 1)
    return jnp.transpose(y, (1, 0, 2))                        # (B, T, 1)


# ----------------------------------------------------------------------------
# Pure-JAX reference (for correctness check)
# ----------------------------------------------------------------------------

def lstm_model_ref(x_btd, layer_params, fc_w, fc_b):
    h_all = x_btd.astype(jnp.float32)
    for (w_ih, w_hh, b_ih, b_hh) in layer_params:
        B, T, _ = h_all.shape
        H = w_hh.shape[1]

        def step(carry, x_t, w_ih=w_ih, w_hh=w_hh, b_ih=b_ih, b_hh=b_hh):
            h, c = carry
            gates = x_t @ w_ih.T + b_ih + h @ w_hh.T + b_hh
            i, f, g, o = jnp.split(gates, 4, axis=-1)
            i = jax.nn.sigmoid(i)
            f = jax.nn.sigmoid(f)
            g = jnp.tanh(g)
            o = jax.nn.sigmoid(o)
            c = f * c + i * g
            h = o * jnp.tanh(c)
            return (h, c), h

        h0 = jnp.zeros((B, H), jnp.float32)
        c0 = jnp.zeros((B, H), jnp.float32)
        _, hs = jax.lax.scan(step, (h0, c0), jnp.transpose(h_all, (1, 0, 2)))
        h_all = jnp.transpose(hs, (1, 0, 2))
    return h_all @ fc_w.T + fc_b


# ----------------------------------------------------------------------------
# Main
# ----------------------------------------------------------------------------

if __name__ == "__main__":
    B, T = 2, 8
    input_size, hidden_size, num_layers = 8, 32, 2

    key = jax.random.PRNGKey(0)
    k_scale = 1.0 / jnp.sqrt(hidden_size)   # PyTorch-style uniform init range

    layer_params = []
    for layer in range(num_layers):
        d_in = input_size if layer == 0 else hidden_size
        key, k1, k2, k3, k4 = jax.random.split(key, 5)
        w_ih = jax.random.uniform(k1, (4 * hidden_size, d_in),
                                  minval=-k_scale, maxval=k_scale)
        w_hh = jax.random.uniform(k2, (4 * hidden_size, hidden_size),
                                  minval=-k_scale, maxval=k_scale)
        b_ih = jax.random.uniform(k3, (4 * hidden_size,),
                                  minval=-k_scale, maxval=k_scale)
        b_hh = jax.random.uniform(k4, (4 * hidden_size,),
                                  minval=-k_scale, maxval=k_scale)
        layer_params.append((w_ih, w_hh, b_ih, b_hh))

    key, kfw, kfb, kx = jax.random.split(key, 4)
    fc_w = jax.random.uniform(kfw, (1, hidden_size), minval=-k_scale, maxval=k_scale)
    fc_b = jax.random.uniform(kfb, (1,), minval=-k_scale, maxval=k_scale)

    x = jax.random.normal(kx, (B, T, input_size), dtype=jnp.float32)

    out = lstm_model_forward(x, layer_params, fc_w, fc_b)
    out = jax.block_until_ready(out)

    ref = jax.block_until_ready(lstm_model_ref(x, layer_params, fc_w, fc_b))

    assert out.shape == (B, T, 1), out.shape
    max_err = float(jnp.max(jnp.abs(out - ref)))
    assert jnp.allclose(out, ref, atol=1e-4, rtol=1e-4), max_err

    print("KERNEL_OK")
</pallas_src>

<mosaic_0001>
module attributes {stable_mosaic.version = 11 : i64} {
  func.func @kernel(%arg0: i32, %arg1: memref<64x8xf32, #tpu.memory_space<vmem>>, %arg2: memref<8x128xf32, #tpu.memory_space<vmem>>, %arg3: memref<32x128xf32, #tpu.memory_space<vmem>>, %arg4: memref<1x128xf32, #tpu.memory_space<vmem>>, %arg5: memref<32x128xf32, #tpu.memory_space<vmem>>, %arg6: memref<32x128xf32, #tpu.memory_space<vmem>>, %arg7: memref<1x128xf32, #tpu.memory_space<vmem>>, %arg8: memref<1x32xf32, #tpu.memory_space<vmem>>, %arg9: memref<1x1xf32, #tpu.memory_space<vmem>>, %arg10: memref<64x1xf32, #tpu.memory_space<vmem>>, %arg11: memref<64x128xf32, #tpu.memory_space<vmem>>, %arg12: memref<64x32xf32, #tpu.memory_space<vmem>>) attributes {dimension_semantics = [#tpu.dimension_semantics<arbitrary>], iteration_bounds = array<i64: 1>, scalar_prefetch = 0 : i64, scratch_operands = 2 : i64, tpu.core_type = #tpu.core_type<tc>, window_params = [{pipeline_mode = #tpu.pipeline_mode<synchronous>, transform_indices = @transform_0, window_bounds = array<i64: 64, 8>}, {pipeline_mode = #tpu.pipeline_mode<synchronous>, transform_indices = @transform_1, window_bounds = array<i64: 8, 128>}, {pipeline_mode = #tpu.pipeline_mode<synchronous>, transform_indices = @transform_2, window_bounds = array<i64: 32, 128>}, {pipeline_mode = #tpu.pipeline_mode<synchronous>, transform_indices = @transform_3, window_bounds = array<i64: 1, 128>}, {pipeline_mode = #tpu.pipeline_mode<synchronous>, transform_indices = @transform_4, window_bounds = array<i64: 32, 128>}, {pipeline_mode = #tpu.pipeline_mode<synchronous>, transform_indices = @transform_5, window_bounds = array<i64: 32, 128>}, {pipeline_mode = #tpu.pipeline_mode<synchronous>, transform_indices = @transform_6, window_bounds = array<i64: 1, 128>}, {pipeline_mode = #tpu.pipeline_mode<synchronous>, transform_indices = @transform_7, window_bounds = array<i64: 1, 32>}, {pipeline_mode = #tpu.pipeline_mode<synchronous>, transform_indices = @transform_8, window_bounds = array<i64: 1, 1>}, {pipeline_mode = #tpu.pipeline_mode<synchronous>, transform_indices = @transform_9, window_bounds = array<i64: 64, 1>}]} {
    %c0 = arith.constant 0 : index
    %c0_0 = arith.constant 0 : index
    %0 = vector.load %arg1[%c0, %c0_0] : memref<64x8xf32, #tpu.memory_space<vmem>>, vector<64x8xf32>
    %c0_1 = arith.constant 0 : index
    %c0_2 = arith.constant 0 : index
    %1 = vector.load %arg2[%c0_1, %c0_2] : memref<8x128xf32, #tpu.memory_space<vmem>>, vector<8x128xf32>
    %c0_3 = arith.constant 0 : index
    %c0_4 = arith.constant 0 : index
    %2 = vector.load %arg3[%c0_3, %c0_4] : memref<32x128xf32, #tpu.memory_space<vmem>>, vector<32x128xf32>
    %c0_5 = arith.constant 0 : index
    %c0_6 = arith.constant 0 : index
    %3 = vector.load %arg4[%c0_5, %c0_6] : memref<1x128xf32, #tpu.memory_space<vmem>>, vector<1x128xf32>
    %cst = arith.constant dense<0.000000e+00> : vector<64x128xf32>
    %4 = tpu.matmul %0, %1, %cst {dimension_numbers = #tpu.dot_dimension_numbers<[1], [0], [0], [1], [0, 0, 1, 1], [], []>} : vector<64x8xf32>, vector<8x128xf32>, vector<64x128xf32> -> vector<64x128xf32>
    %5 = vector.broadcast %3 : vector<1x128xf32> to vector<64x128xf32>
    %6 = arith.addf %4, %5 : vector<64x128xf32>
    %c0_7 = arith.constant 0 : index
    %c0_8 = arith.constant 0 : index
    %7 = vector.load %arg11[%c0_7, %c0_8] : memref<64x128xf32, #tpu.memory_space<vmem>>, vector<64x128xf32>
    tpu.vector_store %arg11[%c0_7, %c0_8], %6 {strides = array<i32>} : memref<64x128xf32, #tpu.memory_space<vmem>>, vector<64x128xf32>,
    %cst_9 = arith.constant 0.000000e+00 : f32
    %8 = vector.broadcast %cst_9 : f32 to vector<8x32xf32>
    %cst_10 = arith.constant 0.000000e+00 : f32
    %9 = vector.broadcast %cst_10 : f32 to vector<8x32xf32>
    %c0_11 = arith.constant 0 : index
    %c0_12 = arith.constant 0 : index
    %10 = vector.load %arg11[%c0_11, %c0_12] : memref<64x128xf32, #tpu.memory_space<vmem>>, vector<8x128xf32>
    %cst_13 = arith.constant dense<0.000000e+00> : vector<8x128xf32>
    %11 = tpu.matmul %8, %2, %cst_13 {dimension_numbers = #tpu.dot_dimension_numbers<[1], [0], [0], [1], [0, 0, 1, 1], [], []>} : vector<8x32xf32>, vector<32x128xf32>, vector<8x128xf32> -> vector<8x128xf32>
    %12 = arith.addf %10, %11 : vector<8x128xf32>
    %13 = arith.negf %12 : vector<8x128xf32>
    %14 = math.exp %13 : vector<8x128xf32>
    %cst_14 = arith.constant 1.000000e+00 : f32
    %15 = vector.broadcast %cst_14 : f32 to vector<8x128xf32>
    %16 = arith.addf %15, %14 : vector<8x128xf32>
    %17 = arith.divf %15, %16 : vector<8x128xf32>
    %18 = math.tanh %12 : vector<8x128xf32>
    %19 = vector.extract_strided_slice %17 {offsets = [0, 0], sizes = [8, 32], strides = [1, 1]} : vector<8x128xf32> to vector<8x32xf32>
    %20 = vector.extract_strided_slice %17 {offsets = [0, 32], sizes = [8, 32], strides = [1, 1]} : vector<8x128xf32> to vector<8x32xf32>
    %21 = vector.extract_strided_slice %18 {offsets = [0, 64], sizes = [8, 32], strides = [1, 1]} : vector<8x128xf32> to vector<8x32xf32>
    %22 = vector.extract_strided_slice %17 {offsets = [0, 96], sizes = [8, 32], strides = [1, 1]} : vector<8x128xf32> to vector<8x32xf32>
    %23 = arith.mulf %20, %9 : vector<8x32xf32>
    %24 = arith.mulf %19, %21 : vector<8x32xf32>
    %25 = arith.addf %23, %24 : vector<8x32xf32>
    %26 = math.tanh %25 : vector<8x32xf32>
    %27 = arith.mulf %22, %26 : vector<8x32xf32>
    %c0_15 = arith.constant 0 : index
    %c0_16 = arith.constant 0 : index
    %28 = vector.load %arg12[%c0_15, %c0_16] : memref<64x32xf32, #tpu.memory_space<vmem>>, vector<8x32xf32>
    tpu.vector_store %arg12[%c0_15, %c0_16], %27 {strides = array<i32>} : memref<64x32xf32, #tpu.memory_space<vmem>>, vector<8x32xf32>,
    %c8 = arith.constant 8 : index
    %c0_17 = arith.constant 0 : index
    %29 = vector.load %arg11[%c8, %c0_17] : memref<64x128xf32, #tpu.memory_space<vmem>>, vector<8x128xf32>
    %cst_18 = arith.constant dense<0.000000e+00> : vector<8x128xf32>
    %30 = tpu.matmul %27, %2, %cst_18 {dimension_numbers = #tpu.dot_dimension_numbers<[1], [0], [0], [1], [0, 0, 1, 1], [], []>} : vector<8x32xf32>, vector<32x128xf32>, vector<8x128xf32> -> vector<8x128xf32>
    %31 = arith.addf %29, %30 : vector<8x128xf32>
    %32 = arith.negf %31 : vector<8x128xf32>
    %33 = math.exp %32 : vector<8x128xf32>
    %cst_19 = arith.constant 1.000000e+00 : f32
    %34 = vector.broadcast %cst_19 : f32 to vector<8x128xf32>
    %35 = arith.addf %34, %33 : vector<8x128xf32>
    %36 = arith.divf %34, %35 : vector<8x128xf32>
    %37 = math.tanh %31 : vector<8x128xf32>
    %38 = vector.extract_strided_slice %36 {offsets = [0, 0], sizes = [8, 32], strides = [1, 1]} : vector<8x128xf32> to vector<8x32xf32>
    %39 = vector.extract_strided_slice %36 {offsets = [0, 32], sizes = [8, 32], strides = [1, 1]} : vector<8x128xf32> to vector<8x32xf32>
    %40 = vector.extract_strided_slice %37 {offsets = [0, 64], sizes = [8, 32], strides = [1, 1]} : vector<8x128xf32> to vector<8x32xf32>
    %41 = vector.extract_strided_slice %36 {offsets = [0, 96], sizes = [8, 32], strides = [1, 1]} : vector<8x128xf32> to vector<8x32xf32>
    %42 = arith.mulf %39, %25 : vector<8x32xf32>
    %43 = arith.mulf %38, %40 : vector<8x32xf32>
    %44 = arith.addf %42, %43 : vector<8x32xf32>
    %45 = math.tanh %44 : vector<8x32xf32>
    %46 = arith.mulf %41, %45 : vector<8x32xf32>
    %c8_20 = arith.constant 8 : index
    %c0_21 = arith.constant 0 : index
    %47 = vector.load %arg12[%c8_20, %c0_21] : memref<64x32xf32, #tpu.memory_space<vmem>>, vector<8x32xf32>
    tpu.vector_store %arg12[%c8_20, %c0_21], %46 {strides = array<i32>} : memref<64x32xf32, #tpu.memory_space<vmem>>, vector<8x32xf32>,
    %c16 = arith.constant 16 : index
    %c0_22 = arith.constant 0 : index
    %48 = vector.load %arg11[%c16, %c0_22] : memref<64x128xf32, #tpu.memory_space<vmem>>, vector<8x128xf32>
    %cst_23 = arith.constant dense<0.000000e+00> : vector<8x128xf32>
    %49 = tpu.matmul %46, %2, %cst_23 {dimension_numbers = #tpu.dot_dimension_numbers<[1], [0], [0], [1], [0, 0, 1, 1], [], []>} : vector<8x32xf32>, vector<32x128xf32>, vector<8x128xf32> -> vector<8x128xf32>
    %50 = arith.addf %48, %49 : vector<8x128xf32>
    %51 = arith.negf %50 : vector<8x128xf32>
    %52 = math.exp %51 : vector<8x128xf32>
    %cst_24 = arith.constant 1.000000e+00 : f32
    %53 = vector.broadcast %cst_24 : f32 to vector<8x128xf32>
    %54 = arith.addf %53, %52 : vector<8x128xf32>
    %55 = arith.divf %53, %54 : vector<8x128xf32>
    %56 = math.tanh %50 : vector<8x128xf32>
    %57 = vector.extract_strided_slice %55 {offsets = [0, 0], sizes = [8, 32], strides = [1, 1]} : vector<8x128xf32> to vector<8x32xf32>
    %58 = vector.extract_strided_slice %55 {offsets = [0, 32], sizes = [8, 32], strides = [1, 1]} : vector<8x128xf32> to vector<8x32xf32>
    %59 = vector.extract_strided_slice %56 {offsets = [0, 64], sizes = [8, 32], strides = [1, 1]} : vector<8x128xf32> to vector<8x32xf32>
    %60 = vector.extract_strided_slice %55 {offsets = [0, 96], sizes = [8, 32], strides = [1, 1]} : vector<8x128xf32> to vector<8x32xf32>
    %61 = arith.mulf %58, %44 : vector<8x32xf32>
    %62 = arith.mulf %57, %59 : vector<8x32xf32>
    %63 = arith.addf %61, %62 : vector<8x32xf32>
    %64 = math.tanh %63 : vector<8x32xf32>
    %65 = arith.mulf %60, %64 : vector<8x32xf32>
    %c16_25 = arith.constant 16 : index
    %c0_26 = arith.constant 0 : index
    %66 = vector.load %arg12[%c16_25, %c0_26] : memref<64x32xf32, #tpu.memory_space<vmem>>, vector<8x32xf32>
    tpu.vector_store %arg12[%c16_25, %c0_26], %65 {strides = array<i32>} : memref<64x32xf32, #tpu.memory_space<vmem>>, vector<8x32xf32>,
    %c24 = arith.constant 24 : index
    %c0_27 = arith.constant 0 : index
    %67 = vector.load %arg11[%c24, %c0_27] : memref<64x128xf32, #tpu.memory_space<vmem>>, vector<8x128xf32>
    %cst_28 = arith.constant dense<0.000000e+00> : vector<8x128xf32>
    %68 = tpu.matmul %65, %2, %cst_28 {dimension_numbers = #tpu.dot_dimension_numbers<[1], [0], [0], [1], [0, 0, 1, 1], [], []>} : vector<8x32xf32>, vector<32x128xf32>, vector<8x128xf32> -> vector<8x128xf32>
    %69 = arith.addf %67, %68 : vector<8x128xf32>
    %70 = arith.negf %69 : vector<8x128xf32>
    %71 = math.exp %70 : vector<8x128xf32>
    %cst_29 = arith.constant 1.000000e+00 : f32
    %72 = vector.broadcast %cst_29 : f32 to vector<8x128xf32>
    %73 = arith.addf %72, %71 : vector<8x128xf32>
    %74 = arith.divf %72, %73 : vector<8x128xf32>
    %75 = math.tanh %69 : vector<8x128xf32>
    %76 = vector.extract_strided_slice %74 {offsets = [0, 0], sizes = [8, 32], strides = [1, 1]} : vector<8x128xf32> to vector<8x32xf32>
    %77 = vector.extract_strided_slice %74 {offsets = [0, 32], sizes = [8, 32], strides = [1, 1]} : vector<8x128xf32> to vector<8x32xf32>
    %78 = vector.extract_strided_slice %75 {offsets = [0, 64], sizes = [8, 32], strides = [1, 1]} : vector<8x128xf32> to vector<8x32xf32>
    %79 = vector.extract_strided_slice %74 {offsets = [0, 96], sizes = [8, 32], strides = [1, 1]} : vector<8x128xf32> to vector<8x32xf32>
    %80 = arith.mulf %77, %63 : vector<8x32xf32>
    %81 = arith.mulf %76, %78 : vector<8x32xf32>
    %82 = arith.addf %80, %81 : vector<8x32xf32>
    %83 = math.tanh %82 : vector<8x32xf32>
    %84 = arith.mulf %79, %83 : vector<8x32xf32>
    %c24_30 = arith.constant 24 : index
    %c0_31 = arith.constant 0 : index
    %85 = vector.load %arg12[%c24_30, %c0_31] : memref<64x32xf32, #tpu.memory_space<vmem>>, vector<8x32xf32>
    tpu.vector_store %arg12[%c24_30, %c0_31], %84 {strides = array<i32>} : memref<64x32xf32, #tpu.memory_space<vmem>>, vector<8x32xf32>,
    %c32 = arith.constant 32 : index
    %c0_32 = arith.constant 0 : index
    %86 = vector.load %arg11[%c32, %c0_32] : memref<64x128xf32, #tpu.memory_space<vmem>>, vector<8x128xf32>
    %cst_33 = arith.constant dense<0.000000e+00> : vector<8x128xf32>
    %87 = tpu.matmul %84, %2, %cst_33 {dimension_numbers = #tpu.dot_dimension_numbers<[1], [0], [0], [1], [0, 0, 1, 1], [], []>} : vector<8x32xf32>, vector<32x128xf32>, vector<8x128xf32> -> vector<8x128xf32>
    %88 = arith.addf %86, %87 : vector<8x128xf32>
    %89 = arith.negf %88 : vector<8x128xf32>
    %90 = math.exp %89 : vector<8x128xf32>
    %cst_34 = arith.constant 1.000000e+00 : f32
    %91 = vector.broadcast %cst_34 : f32 to vector<8x128xf32>
    %92 = arith.addf %91, %90 : vector<8x128xf32>
    %93 = arith.divf %91, %92 : vector<8x128xf32>
    %94 = math.tanh %88 : vector<8x128xf32>
    %95 = vector.extract_strided_slice %93 {offsets = [0, 0], sizes = [8, 32], strides = [1, 1]} : vector<8x128xf32> to vector<8x32xf32>
    %96 = vector.extract_strided_slice %93 {offsets = [0, 32], sizes = [8, 32], strides = [1, 1]} : vector<8x128xf32> to vector<8x32xf32>
    %97 = vector.extract_strided_slice %94 {offsets = [0, 64], sizes = [8, 32], strides = [1, 1]} : vector<8x128xf32> to vector<8x32xf32>
    %98 = vector.extract_strided_slice %93 {offsets = [0, 96], sizes = [8, 32], strides = [1, 1]} : vector<8x128xf32> to vector<8x32xf32>
    %99 = arith.mulf %96, %82 : vector<8x32xf32>
    %100 = arith.mulf %95, %97 : vector<8x32xf32>
    %101 = arith.addf %99, %100 : vector<8x32xf32>
    %102 = math.tanh %101 : vector<8x32xf32>
    %103 = arith.mulf %98, %102 : vector<8x32xf32>
    %c32_35 = arith.constant 32 : index
    %c0_36 = arith.constant 0 : index
    %104 = vector.load %arg12[%c32_35, %c0_36] : memref<64x32xf32, #tpu.memory_space<vmem>>, vector<8x32xf32>
    tpu.vector_store %arg12[%c32_35, %c0_36], %103 {strides = array<i32>} : memref<64x32xf32, #tpu.memory_space<vmem>>, vector<8x32xf32>,
    %c40 = arith.constant 40 : index
    %c0_37 = arith.constant 0 : index
    %105 = vector.load %arg11[%c40, %c0_37] : memref<64x128xf32, #tpu.memory_space<vmem>>, vector<8x128xf32>
    %cst_38 = arith.constant dense<0.000000e+00> : vector<8x128xf32>
    %106 = tpu.matmul %103, %2, %cst_38 {dimension_numbers = #tpu.dot_dimension_numbers<[1], [0], [0], [1], [0, 0, 1, 1], [], []>} : vector<8x32xf32>, vector<32x128xf32>, vector<8x128xf32> -> vector<8x128xf32>
    %107 = arith.addf %105, %106 : vector<8x128xf32>
    %108 = arith.negf %107 : vector<8x128xf32>
    %109 = math.exp %108 : vector<8x128xf32>
    %cst_39 = arith.constant 1.000000e+00 : f32
    %110 = vector.broadcast %cst_39 : f32 to vector<8x128xf32>
    %111 = arith.addf %110, %109 : vector<8x128xf32>
    %112 = arith.divf %110, %111 : vector<8x128xf32>
    %113 = math.tanh %107 : vector<8x128xf32>
    %114 = vector.extract_strided_slice %112 {offsets = [0, 0], sizes = [8, 32], strides = [1, 1]} : vector<8x128xf32> to vector<8x32xf32>
    %115 = vector.extract_strided_slice %112 {offsets = [0, 32], sizes = [8, 32], strides = [1, 1]} : vector<8x128xf32> to vector<8x32xf32>
    %116 = vector.extract_strided_slice %113 {offsets = [0, 64], sizes = [8, 32], strides = [1, 1]} : vector<8x128xf32> to vector<8x32xf32>
    %117 = vector.extract_strided_slice %112 {offsets = [0, 96], sizes = [8, 32], strides = [1, 1]} : vector<8x128xf32> to vector<8x32xf32>
    %118 = arith.mulf %115, %101 : vector<8x32xf32>
    %119 = arith.mulf %114, %116 : vector<8x32xf32>
    %120 = arith.addf %118, %119 : vector<8x32xf32>
    %121 = math.tanh %120 : vector<8x32xf32>
    %122 = arith.mulf %117, %121 : vector<8x32xf32>
    %c40_40 = arith.constant 40 : index
    %c0_41 = arith.constant 0 : index
    %123 = vector.load %arg12[%c40_40, %c0_41] : memref<64x32xf32, #tpu.memory_space<vmem>>, vector<8x32xf32>
    tpu.vector_store %arg12[%c40_40, %c0_41], %122 {strides = array<i32>} : memref<64x32xf32, #tpu.memory_space<vmem>>, vector<8x32xf32>,
    %c48 = arith.constant 48 : index
    %c0_42 = arith.constant 0 : index
    %124 = vector.load %arg11[%c48, %c0_42] : memref<64x128xf32, #tpu.memory_space<vmem>>, vector<8x128xf32>
    %cst_43 = arith.constant dense<0.000000e+00> : vector<8x128xf32>
    %125 = tpu.matmul %122, %2, %cst_43 {dimension_numbers = #tpu.dot_dimension_numbers<[1], [0], [0], [1], [0, 0, 1, 1], [], []>} : vector<8x32xf32>, vector<32x128xf32>, vector<8x128xf32> -> vector<8x128xf32>
    %126 = arith.addf %124, %125 : vector<8x128xf32>
    %127 = arith.negf %126 : vector<8x128xf32>
    %128 = math.exp %127 : vector<8x128xf32>
    %cst_44 = arith.constant 1.000000e+00 : f32
    %129 = vector.broadcast %cst_44 : f32 to vector<8x128xf32>
    %130 = arith.addf %129, %128 : vector<8x128xf32>
    %131 = arith.divf %129, %130 : vector<8x128xf32>
    %132 = math.tanh %126 : vector<8x128xf32>
    %133 = vector.extract_strided_slice %131 {offsets = [0, 0], sizes = [8, 32], strides = [1, 1]} : vector<8x128xf32> to vector<8x32xf32>
    %134 = vector.extract_strided_slice %131 {offsets = [0, 32], sizes = [8, 32], strides = [1, 1]} : vector<8x128xf32> to vector<8x32xf32>
    %135 = vector.extract_strided_slice %132 {offsets = [0, 64], sizes = [8, 32], strides = [1, 1]} : vector<8x128xf32> to vector<8x32xf32>
    %136 = vector.extract_strided_slice %131 {offsets = [0, 96], sizes = [8, 32], strides = [1, 1]} : vector<8x128xf32> to vector<8x32xf32>
    %137 = arith.mulf %134, %120 : vector<8x32xf32>
    %138 = arith.mulf %133, %135 : vector<8x32xf32>
    %139 = arith.addf %137, %138 : vector<8x32xf32>
    %140 = math.tanh %139 : vector<8x32xf32>
    %141 = arith.mulf %136, %140 : vector<8x32xf32>
    %c48_45 = arith.constant 48 : index
    %c0_46 = arith.constant 0 : index
    %142 = vector.load %arg12[%c48_45, %c0_46] : memref<64x32xf32, #tpu.memory_space<vmem>>, vector<8x32xf32>
    tpu.vector_store %arg12[%c48_45, %c0_46], %141 {strides = array<i32>} : memref<64x32xf32, #tpu.memory_space<vmem>>, vector<8x32xf32>,
    %c56 = arith.constant 56 : index
    %c0_47 = arith.constant 0 : index
    %143 = vector.load %arg11[%c56, %c0_47] : memref<64x128xf32, #tpu.memory_space<vmem>>, vector<8x128xf32>
    %cst_48 = arith.constant dense<0.000000e+00> : vector<8x128xf32>
    %144 = tpu.matmul %141, %2, %cst_48 {dimension_numbers = #tpu.dot_dimension_numbers<[1], [0], [0], [1], [0, 0, 1, 1], [], []>} : vector<8x32xf32>, vector<32x128xf32>, vector<8x128xf32> -> vector<8x128xf32>
    %145 = arith.addf %143, %144 : vector<8x128xf32>
    %146 = arith.negf %145 : vector<8x128xf32>
    %147 = math.exp %146 : vector<8x128xf32>
    %cst_49 = arith.constant 1.000000e+00 : f32
    %148 = vector.broadcast %cst_49 : f32 to vector<8x128xf32>
    %149 = arith.addf %148, %147 : vector<8x128xf32>
    %150 = arith.divf %148, %149 : vector<8x128xf32>
    %151 = math.tanh %145 : vector<8x128xf32>
    %152 = vector.extract_strided_slice %150 {offsets = [0, 0], sizes = [8, 32], strides = [1, 1]} : vector<8x128xf32> to vector<8x32xf32>
    %153 = vector.extract_strided_slice %150 {offsets = [0, 32], sizes = [8, 32], strides = [1, 1]} : vector<8x128xf32> to vector<8x32xf32>
    %154 = vector.extract_strided_slice %151 {offsets = [0, 64], sizes = [8, 32], strides = [1, 1]} : vector<8x128xf32> to vector<8x32xf32>
    %155 = vector.extract_strided_slice %150 {offsets = [0, 96], sizes = [8, 32], strides = [1, 1]} : vector<8x128xf32> to vector<8x32xf32>
    %156 = arith.mulf %153, %139 : vector<8x32xf32>
    %157 = arith.mulf %152, %154 : vector<8x32xf32>
    %158 = arith.addf %156, %157 : vector<8x32xf32>
    %159 = math.tanh %158 : vector<8x32xf32>
    %160 = arith.mulf %155, %159 : vector<8x32xf32>
    %c56_50 = arith.constant 56 : index
    %c0_51 = arith.constant 0 : index
    %161 = vector.load %arg12[%c56_50, %c0_51] : memref<64x32xf32, #tpu.memory_space<vmem>>, vector<8x32xf32>
    tpu.vector_store %arg12[%c56_50, %c0_51], %160 {strides = array<i32>} : memref<64x32xf32, #tpu.memory_space<vmem>>, vector<8x32xf32>,
    %c0_52 = arith.constant 0 : index
    %c0_53 = arith.constant 0 : index
    %162 = vector.load %arg12[%c0_52, %c0_53] : memref<64x32xf32, #tpu.memory_space<vmem>>, vector<64x32xf32>
    %c0_54 = arith.constant 0 : index
    %c0_55 = arith.constant 0 : index
    %163 = vector.load %arg5[%c0_54, %c0_55] : memref<32x128xf32, #tpu.memory_space<vmem>>, vector<32x128xf32>
    %c0_56 = arith.constant 0 : index
    %c0_57 = arith.constant 0 : index
    %164 = vector.load %arg6[%c0_56, %c0_57] : memref<32x128xf32, #tpu.memory_space<vmem>>, vector<32x128xf32>
    %c0_58 = arith.constant 0 : index
    %c0_59 = arith.constant 0 : index
    %165 = vector.load %arg7[%c0_58, %c0_59] : memref<1x128xf32, #tpu.memory_space<vmem>>, vector<1x128xf32>
    %cst_60 = arith.constant dense<0.000000e+00> : vector<64x128xf32>
    %166 = tpu.matmul %162, %163, %cst_60 {dimension_numbers = #tpu.dot_dimension_numbers<[1], [0], [0], [1], [0, 0, 1, 1], [], []>} : vector<64x32xf32>, vector<32x128xf32>, vector<64x128xf32> -> vector<64x128xf32>
    %167 = vector.broadcast %165 : vector<1x128xf32> to vector<64x128xf32>
    %168 = arith.addf %166, %167 : vector<64x128xf32>
    %c0_61 = arith.constant 0 : index
    %c0_62 = arith.constant 0 : index
    %169 = vector.load %arg11[%c0_61, %c0_62] : memref<64x128xf32, #tpu.memory_space<vmem>>, vector<64x128xf32>
    tpu.vector_store %arg11[%c0_61, %c0_62], %168 {strides = array<i32>} : memref<64x128xf32, #tpu.memory_space<vmem>>, vector<64x128xf32>,
    %cst_63 = arith.constant 0.000000e+00 : f32
    %170 = vector.broadcast %cst_63 : f32 to vector<8x32xf32>
    %cst_64 = arith.constant 0.000000e+00 : f32
    %171 = vector.broadcast %cst_64 : f32 to vector<8x32xf32>
    %c0_65 = arith.constant 0 : index
    %c0_66 = arith.constant 0 : index
    %172 = vector.load %arg11[%c0_65, %c0_66] : memref<64x128xf32, #tpu.memory_space<vmem>>, vector<8x128xf32>
    %cst_67 = arith.constant dense<0.000000e+00> : vector<8x128xf32>
    %173 = tpu.matmul %170, %164, %cst_67 {dimension_numbers = #tpu.dot_dimension_numbers<[1], [0], [0], [1], [0, 0, 1, 1], [], []>} : vector<8x32xf32>, vector<32x128xf32>, vector<8x128xf32> -> vector<8x128xf32>
    %174 = arith.addf %172, %173 : vector<8x128xf32>
    %175 = arith.negf %174 : vector<8x128xf32>
    %176 = math.exp %175 : vector<8x128xf32>
    %cst_68 = arith.constant 1.000000e+00 : f32
    %177 = vector.broadcast %cst_68 : f32 to vector<8x128xf32>
    %178 = arith.addf %177, %176 : vector<8x128xf32>
    %179 = arith.divf %177, %178 : vector<8x128xf32>
    %180 = math.tanh %174 : vector<8x128xf32>
    %181 = vector.extract_strided_slice %179 {offsets = [0, 0], sizes = [8, 32], strides = [1, 1]} : vector<8x128xf32> to vector<8x32xf32>
    %182 = vector.extract_strided_slice %179 {offsets = [0, 32], sizes = [8, 32], strides = [1, 1]} : vector<8x128xf32> to vector<8x32xf32>
    %183 = vector.extract_strided_slice %180 {offsets = [0, 64], sizes = [8, 32], strides = [1, 1]} : vector<8x128xf32> to vector<8x32xf32>
    %184 = vector.extract_strided_slice %179 {offsets = [0, 96], sizes = [8, 32], strides = [1, 1]} : vector<8x128xf32> to vector<8x32xf32>
    %185 = arith.mulf %182, %171 : vector<8x32xf32>
    %186 = arith.mulf %181, %183 : vector<8x32xf32>
    %187 = arith.addf %185, %186 : vector<8x32xf32>
    %188 = math.tanh %187 : vector<8x32xf32>
    %189 = arith.mulf %184, %188 : vector<8x32xf32>
    %c0_69 = arith.constant 0 : index
    %c0_70 = arith.constant 0 : index
    %190 = vector.load %arg12[%c0_69, %c0_70] : memref<64x32xf32, #tpu.memory_space<vmem>>, vector<8x32xf32>
    tpu.vector_store %arg12[%c0_69, %c0_70], %189 {strides = array<i32>} : memref<64x32xf32, #tpu.memory_space<vmem>>, vector<8x32xf32>,
    %c8_71 = arith.constant 8 : index
    %c0_72 = arith.constant 0 : index
    %191 = vector.load %arg11[%c8_71, %c0_72] : memref<64x128xf32, #tpu.memory_space<vmem>>, vector<8x128xf32>
    %cst_73 = arith.constant dense<0.000000e+00> : vector<8x128xf32>
    %192 = tpu.matmul %189, %164, %cst_73 {dimension_numbers = #tpu.dot_dimension_numbers<[1], [0], [0], [1], [0, 0, 1, 1], [], []>} : vector<8x32xf32>, vector<32x128xf32>, vector<8x128xf32> -> vector<8x128xf32>
    %193 = arith.addf %191, %192 : vector<8x128xf32>
    %194 = arith.negf %193 : vector<8x128xf32>
    %195 = math.exp %194 : vector<8x128xf32>
    %cst_74 = arith.constant 1.000000e+00 : f32
    %196 = vector.broadcast %cst_74 : f32 to vector<8x128xf32>
    %197 = arith.addf %196, %195 : vector<8x128xf32>
    %198 = arith.divf %196, %197 : vector<8x128xf32>
    %199 = math.tanh %193 : vector<8x128xf32>
    %200 = vector.extract_strided_slice %198 {offsets = [0, 0], sizes = [8, 32], strides = [1, 1]} : vector<8x128xf32> to vector<8x32xf32>
    %201 = vector.extract_strided_slice %198 {offsets = [0, 32], sizes = [8, 32], strides = [1, 1]} : vector<8x128xf32> to vector<8x32xf32>
    %202 = vector.extract_strided_slice %199 {offsets = [0, 64], sizes = [8, 32], strides = [1, 1]} : vector<8x128xf32> to vector<8x32xf32>
    %203 = vector.extract_strided_slice %198 {offsets = [0, 96], sizes = [8, 32], strides = [1, 1]} : vector<8x128xf32> to vector<8x32xf32>
    %204 = arith.mulf %201, %187 : vector<8x32xf32>
    %205 = arith.mulf %200, %202 : vector<8x32xf32>
    %206 = arith.addf %204, %205 : vector<8x32xf32>
    %207 = math.tanh %206 : vector<8x32xf32>
    %208 = arith.mulf %203, %207 : vector<8x32xf32>
    %c8_75 = arith.constant 8 : index
    %c0_76 = arith.constant 0 : index
    %209 = vector.load %arg12[%c8_75, %c0_76] : memref<64x32xf32, #tpu.memory_space<vmem>>, vector<8x32xf32>
    tpu.vector_store %arg12[%c8_75, %c0_76], %208 {strides = array<i32>} : memref<64x32xf32, #tpu.memory_space<vmem>>, vector<8x32xf32>,
    %c16_77 = arith.constant 16 : index
    %c0_78 = arith.constant 0 : index
    %210 = vector.load %arg11[%c16_77, %c0_78] : memref<64x128xf32, #tpu.memory_space<vmem>>, vector<8x128xf32>
    %cst_79 = arith.constant dense<0.000000e+00> : vector<8x128xf32>
    %211 = tpu.matmul %208, %164, %cst_79 {dimension_numbers = #tpu.dot_dimension_numbers<[1], [0], [0], [1], [0, 0, 1, 1], [], []>} : vector<8x32xf32>, vector<32x128xf32>, vector<8x128xf32> -> vector<8x128xf32>
    %212 = arith.addf %210, %211 : vector<8x128xf32>
    %213 = arith.negf %212 : vector<8x128xf32>
    %214 = math.exp %213 : vector<8x128xf32>
    %cst_80 = arith.constant 1.000000e+00 : f32
    %215 = vector.broadcast %cst_80 : f32 to vector<8x128xf32>
    %216 = arith.addf %215, %214 : vector<8x128xf32>
    %217 = arith.divf %215, %216 : vector<8x128xf32>
    %218 = math.tanh %212 : vector<8x128xf32>
    %219 = vector.extract_strided_slice %217 {offsets = [0, 0], sizes = [8, 32], strides = [1, 1]} : vector<8x128xf32> to vector<8x32xf32>
    %220 = vector.extract_strided_slice %217 {offsets = [0, 32], sizes = [8, 32], strides = [1, 1]} : vector<8x128xf32> to vector<8x32xf32>
    %221 = vector.extract_strided_slice %218 {offsets = [0, 64], sizes = [8, 32], strides = [1, 1]} : vector<8x128xf32> to vector<8x32xf32>
    %222 = vector.extract_strided_slice %217 {offsets = [0, 96], sizes = [8, 32], strides = [1, 1]} : vector<8x128xf32> to vector<8x32xf32>
    %223 = arith.mulf %220, %206 : vector<8x32xf32>
    %224 = arith.mulf %219, %221 : vector<8x32xf32>
    %225 = arith.addf %223, %224 : vector<8x32xf32>
    %226 = math.tanh %225 : vector<8x32xf32>
    %227 = arith.mulf %222, %226 : vector<8x32xf32>
    %c16_81 = arith.constant 16 : index
    %c0_82 = arith.constant 0 : index
    %228 = vector.load %arg12[%c16_81, %c0_82] : memref<64x32xf32, #tpu.memory_space<vmem>>, vector<8x32xf32>
    tpu.vector_store %arg12[%c16_81, %c0_82], %227 {strides = array<i32>} : memref<64x32xf32, #tpu.memory_space<vmem>>, vector<8x32xf32>,
    %c24_83 = arith.constant 24 : index
    %c0_84 = arith.constant 0 : index
    %229 = vector.load %arg11[%c24_83, %c0_84] : memref<64x128xf32, #tpu.memory_space<vmem>>, vector<8x128xf32>
    %cst_85 = arith.constant dense<0.000000e+00> : vector<8x128xf32>
    %230 = tpu.matmul %227, %164, %cst_85 {dimension_numbers = #tpu.dot_dimension_numbers<[1], [0], [0], [1], [0, 0, 1, 1], [], []>} : vector<8x32xf32>, vector<32x128xf32>, vector<8x128xf32> -> vector<8x128xf32>
    %231 = arith.addf %229, %230 : vector<8x128xf32>
    %232 = arith.negf %231 : vector<8x128xf32>
    %233 = math.exp %232 : vector<8x128xf32>
    %cst_86 = arith.constant 1.000000e+00 : f32
    %234 = vector.broadcast %cst_86 : f32 to vector<8x128xf32>
    %235 = arith.addf %234, %233 : vector<8x128xf32>
    %236 = arith.divf %234, %235 : vector<8x128xf32>
    %237 = math.tanh %231 : vector<8x128xf32>
    %238 = vector.extract_strided_slice %236 {offsets = [0, 0], sizes = [8, 32], strides = [1, 1]} : vector<8x128xf32> to vector<8x32xf32>
    %239 = vector.extract_strided_slice %236 {offsets = [0, 32], sizes = [8, 32], strides = [1, 1]} : vector<8x128xf32> to vector<8x32xf32>
    %240 = vector.extract_strided_slice %237 {offsets = [0, 64], sizes = [8, 32], strides = [1, 1]} : vector<8x128xf32> to vector<8x32xf32>
    %241 = vector.extract_strided_slice %236 {offsets = [0, 96], sizes = [8, 32], strides = [1, 1]} : vector<8x128xf32> to vector<8x32xf32>
    %242 = arith.mulf %239, %225 : vector<8x32xf32>
    %243 = arith.mulf %238, %240 : vector<8x32xf32>
    %244 = arith.addf %242, %243 : vector<8x32xf32>
    %245 = math.tanh %244 : vector<8x32xf32>
    %246 = arith.mulf %241, %245 : vector<8x32xf32>
    %c24_87 = arith.constant 24 : index
    %c0_88 = arith.constant 0 : index
    %247 = vector.load %arg12[%c24_87, %c0_88] : memref<64x32xf32, #tpu.memory_space<vmem>>, vector<8x32xf32>
    tpu.vector_store %arg12[%c24_87, %c0_88], %246 {strides = array<i32>} : memref<64x32xf32, #tpu.memory_space<vmem>>, vector<8x32xf32>,
    %c32_89 = arith.constant 32 : index
    %c0_90 = arith.constant 0 : index
    %248 = vector.load %arg11[%c32_89, %c0_90] : memref<64x128xf32, #tpu.memory_space<vmem>>, vector<8x128xf32>
    %cst_91 = arith.constant dense<0.000000e+00> : vector<8x128xf32>
    %249 = tpu.matmul %246, %164, %cst_91 {dimension_numbers = #tpu.dot_dimension_numbers<[1], [0], [0], [1], [0, 0, 1, 1], [], []>} : vector<8x32xf32>, vector<32x128xf32>, vector<8x128xf32> -> vector<8x128xf32>
    %250 = arith.addf %248, %249 : vector<8x128xf32>
    %251 = arith.negf %250 : vector<8x128xf32>
    %252 = math.exp %251 : vector<8x128xf32>
    %cst_92 = arith.constant 1.000000e+00 : f32
    %253 = vector.broadcast %cst_92 : f32 to vector<8x128xf32>
    %254 = arith.addf %253, %252 : vector<8x128xf32>
    %255 = arith.divf %253, %254 : vector<8x128xf32>
    %256 = math.tanh %250 : vector<8x128xf32>
    %257 = vector.extract_strided_slice %255 {offsets = [0, 0], sizes = [8, 32], strides = [1, 1]} : vector<8x128xf32> to vector<8x32xf32>
    %258 = vector.extract_strided_slice %255 {offsets = [0, 32], sizes = [8, 32], strides = [1, 1]} : vector<8x128xf32> to vector<8x32xf32>
    %259 = vector.extract_strided_slice %256 {offsets = [0, 64], sizes = [8, 32], strides = [1, 1]} : vector<8x128xf32> to vector<8x32xf32>
    %260 = vector.extract_strided_slice %255 {offsets = [0, 96], sizes = [8, 32], strides = [1, 1]} : vector<8x128xf32> to vector<8x32xf32>
    %261 = arith.mulf %258, %244 : vector<8x32xf32>
    %262 = arith.mulf %257, %259 : vector<8x32xf32>
    %263 = arith.addf %261, %262 : vector<8x32xf32>
    %264 = math.tanh %263 : vector<8x32xf32>
    %265 = arith.mulf %260, %264 : vector<8x32xf32>
    %c32_93 = arith.constant 32 : index
    %c0_94 = arith.constant 0 : index
    %266 = vector.load %arg12[%c32_93, %c0_94] : memref<64x32xf32, #tpu.memory_space<vmem>>, vector<8x32xf32>
    tpu.vector_store %arg12[%c32_93, %c0_94], %265 {strides = array<i32>} : memref<64x32xf32, #tpu.memory_space<vmem>>, vector<8x32xf32>,
    %c40_95 = arith.constant 40 : index
    %c0_96 = arith.constant 0 : index
    %267 = vector.load %arg11[%c40_95, %c0_96] : memref<64x128xf32, #tpu.memory_space<vmem>>, vector<8x128xf32>
    %cst_97 = arith.constant dense<0.000000e+00> : vector<8x128xf32>
    %268 = tpu.matmul %265, %164, %cst_97 {dimension_numbers = #tpu.dot_dimension_numbers<[1], [0], [0], [1], [0, 0, 1, 1], [], []>} : vector<8x32xf32>, vector<32x128xf32>, vector<8x128xf32> -> vector<8x128xf32>
    %269 = arith.addf %267, %268 : vector<8x128xf32>
    %270 = arith.negf %269 : vector<8x128xf32>
    %271 = math.exp %270 : vector<8x128xf32>
    %cst_98 = arith.constant 1.000000e+00 : f32
    %272 = vector.broadcast %cst_98 : f32 to vector<8x128xf32>
    %273 = arith.addf %272, %271 : vector<8x128xf32>
    %274 = arith.divf %272, %273 : vector<8x128xf32>
    %275 = math.tanh %269 : vector<8x128xf32>
    %276 = vector.extract_strided_slice %274 {offsets = [0, 0], sizes = [8, 32], strides = [1, 1]} : vector<8x128xf32> to vector<8x32xf32>
    %277 = vector.extract_strided_slice %274 {offsets = [0, 32], sizes = [8, 32], strides = [1, 1]} : vector<8x128xf32> to vector<8x32xf32>
    %278 = vector.extract_strided_slice %275 {offsets = [0, 64], sizes = [8, 32], strides = [1, 1]} : vector<8x128xf32> to vector<8x32xf32>
    %279 = vector.extract_strided_slice %274 {offsets = [0, 96], sizes = [8, 32], strides = [1, 1]} : vector<8x128xf32> to vector<8x32xf32>
    %280 = arith.mulf %277, %263 : vector<8x32xf32>
    %281 = arith.mulf %276, %278 : vector<8x32xf32>
    %282 = arith.addf %280, %281 : vector<8x32xf32>
    %283 = math.tanh %282 : vector<8x32xf32>
    %284 = arith.mulf %279, %283 : vector<8x32xf32>
    %c40_99 = arith.constant 40 : index
    %c0_100 = arith.constant 0 : index
    %285 = vector.load %arg12[%c40_99, %c0_100] : memref<64x32xf32, #tpu.memory_space<vmem>>, vector<8x32xf32>
    tpu.vector_store %arg12[%c40_99, %c0_100], %284 {strides = array<i32>} : memref<64x32xf32, #tpu.memory_space<vmem>>, vector<8x32xf32>,
    %c48_101 = arith.constant 48 : index
    %c0_102 = arith.constant 0 : index
    %286 = vector.load %arg11[%c48_101, %c0_102] : memref<64x128xf32, #tpu.memory_space<vmem>>, vector<8x128xf32>
    %cst_103 = arith.constant dense<0.000000e+00> : vector<8x128xf32>
    %287 = tpu.matmul %284, %164, %cst_103 {dimension_numbers = #tpu.dot_dimension_numbers<[1], [0], [0], [1], [0, 0, 1, 1], [], []>} : vector<8x32xf32>, vector<32x128xf32>, vector<8x128xf32> -> vector<8x128xf32>
    %288 = arith.addf %286, %287 : vector<8x128xf32>
    %289 = arith.negf %288 : vector<8x128xf32>
    %290 = math.exp %289 : vector<8x128xf32>
    %cst_104 = arith.constant 1.000000e+00 : f32
    %291 = vector.broadcast %cst_104 : f32 to vector<8x128xf32>
    %292 = arith.addf %291, %290 : vector<8x128xf32>
    %293 = arith.divf %291, %292 : vector<8x128xf32>
    %294 = math.tanh %288 : vector<8x128xf32>
    %295 = vector.extract_strided_slice %293 {offsets = [0, 0], sizes = [8, 32], strides = [1, 1]} : vector<8x128xf32> to vector<8x32xf32>
    %296 = vector.extract_strided_slice %293 {offsets = [0, 32], sizes = [8, 32], strides = [1, 1]} : vector<8x128xf32> to vector<8x32xf32>
    %297 = vector.extract_strided_slice %294 {offsets = [0, 64], sizes = [8, 32], strides = [1, 1]} : vector<8x128xf32> to vector<8x32xf32>
    %298 = vector.extract_strided_slice %293 {offsets = [0, 96], sizes = [8, 32], strides = [1, 1]} : vector<8x128xf32> to vector<8x32xf32>
    %299 = arith.mulf %296, %282 : vector<8x32xf32>
    %300 = arith.mulf %295, %297 : vector<8x32xf32>
    %301 = arith.addf %299, %300 : vector<8x32xf32>
    %302 = math.tanh %301 : vector<8x32xf32>
    %303 = arith.mulf %298, %302 : vector<8x32xf32>
    %c48_105 = arith.constant 48 : index
    %c0_106 = arith.constant 0 : index
    %304 = vector.load %arg12[%c48_105, %c0_106] : memref<64x32xf32, #tpu.memory_space<vmem>>, vector<8x32xf32>
    tpu.vector_store %arg12[%c48_105, %c0_106], %303 {strides = array<i32>} : memref<64x32xf32, #tpu.memory_space<vmem>>, vector<8x32xf32>,
    %c56_107 = arith.constant 56 : index
    %c0_108 = arith.constant 0 : index
    %305 = vector.load %arg11[%c56_107, %c0_108] : memref<64x128xf32, #tpu.memory_space<vmem>>, vector<8x128xf32>
    %cst_109 = arith.constant dense<0.000000e+00> : vector<8x128xf32>
    %306 = tpu.matmul %303, %164, %cst_109 {dimension_numbers = #tpu.dot_dimension_numbers<[1], [0], [0], [1], [0, 0, 1, 1], [], []>} : vector<8x32xf32>, vector<32x128xf32>, vector<8x128xf32> -> vector<8x128xf32>
    %307 = arith.addf %305, %306 : vector<8x128xf32>
    %308 = arith.negf %307 : vector<8x128xf32>
    %309 = math.exp %308 : vector<8x128xf32>
    %cst_110 = arith.constant 1.000000e+00 : f32
    %310 = vector.broadcast %cst_110 : f32 to vector<8x128xf32>
    %311 = arith.addf %310, %309 : vector<8x128xf32>
    %312 = arith.divf %310, %311 : vector<8x128xf32>
    %313 = math.tanh %307 : vector<8x128xf32>
    %314 = vector.extract_strided_slice %312 {offsets = [0, 0], sizes = [8, 32], strides = [1, 1]} : vector<8x128xf32> to vector<8x32xf32>
    %315 = vector.extract_strided_slice %312 {offsets = [0, 32], sizes = [8, 32], strides = [1, 1]} : vector<8x128xf32> to vector<8x32xf32>
    %316 = vector.extract_strided_slice %313 {offsets = [0, 64], sizes = [8, 32], strides = [1, 1]} : vector<8x128xf32> to vector<8x32xf32>
    %317 = vector.extract_strided_slice %312 {offsets = [0, 96], sizes = [8, 32], strides = [1, 1]} : vector<8x128xf32> to vector<8x32xf32>
    %318 = arith.mulf %315, %301 : vector<8x32xf32>
    %319 = arith.mulf %314, %316 : vector<8x32xf32>
    %320 = arith.addf %318, %319 : vector<8x32xf32>
    %321 = math.tanh %320 : vector<8x32xf32>
    %322 = arith.mulf %317, %321 : vector<8x32xf32>
    %c56_111 = arith.constant 56 : index
    %c0_112 = arith.constant 0 : index
    %323 = vector.load %arg12[%c56_111, %c0_112] : memref<64x32xf32, #tpu.memory_space<vmem>>, vector<8x32xf32>
    tpu.vector_store %arg12[%c56_111, %c0_112], %322 {strides = array<i32>} : memref<64x32xf32, #tpu.memory_space<vmem>>, vector<8x32xf32>,
    %c0_113 = arith.constant 0 : index
    %c0_114 = arith.constant 0 : index
    %324 = vector.load %arg12[%c0_113, %c0_114] : memref<64x32xf32, #tpu.memory_space<vmem>>, vector<64x32xf32>
    %c0_115 = arith.constant 0 : index
    %c0_116 = arith.constant 0 : index
    %325 = vector.load %arg8[%c0_115, %c0_116] : memref<1x32xf32, #tpu.memory_space<vmem>>, vector<1x32xf32>
    %326 = vector.broadcast %325 : vector<1x32xf32> to vector<64x32xf32>
    %327 = arith.mulf %324, %326 : vector<64x32xf32>
    %cst_117 = arith.constant dense<0.000000e+00> : vector<64xf32>
    %328 = vector.multi_reduction <add>, %327, %cst_117 [1] : vector<64x32xf32> to vector<64xf32>
    %329 = vector.shape_cast %328 : vector<64xf32> to vector<64x1xf32>
    %c0_118 = arith.constant 0 : index
    %c0_119 = arith.constant 0 : index
    %330 = vector.load %arg9[%c0_118, %c0_119] : memref<1x1xf32, #tpu.memory_space<vmem>>, vector<1x1xf32>
    %331 = vector.broadcast %330 : vector<1x1xf32> to vector<64x1xf32>
    %332 = arith.addf %329, %331 : vector<64x1xf32>
    %c0_120 = arith.constant 0 : index
    %c0_121 = arith.constant 0 : index
    %333 = vector.load %arg10[%c0_120, %c0_121] : memref<64x1xf32, #tpu.memory_space<vmem>>, vector<64x1xf32>
    tpu.vector_store %arg10[%c0_120, %c0_121], %332 {strides = array<i32>} : memref<64x1xf32, #tpu.memory_space<vmem>>, vector<64x1xf32>,
    return
  }
  func.func @transform_0(%arg0: i32) -> (i32, i32) {
    %c0_i32 = arith.constant 0 : i32
    %c0_i32_0 = arith.constant 0 : i32
    %c0_i32_1 = arith.constant 0 : i32
    return %c0_i32, %c0_i32_0 : i32, i32
  }
  func.func @transform_1(%arg0: i32) -> (i32, i32) {
    %c0_i32 = arith.constant 0 : i32
    %c0_i32_0 = arith.constant 0 : i32
    %c0_i32_1 = arith.constant 0 : i32
    return %c0_i32, %c0_i32_0 : i32, i32
  }
  func.func @transform_2(%arg0: i32) -> (i32, i32) {
    %c0_i32 = arith.constant 0 : i32
    %c0_i32_0 = arith.constant 0 : i32
    %c0_i32_1 = arith.constant 0 : i32
    return %c0_i32, %c0_i32_0 : i32, i32
  }
  func.func @transform_3(%arg0: i32) -> (i32, i32) {
    %c0_i32 = arith.constant 0 : i32
    %c0_i32_0 = arith.constant 0 : i32
    %c0_i32_1 = arith.constant 0 : i32
    return %c0_i32, %c0_i32_0 : i32, i32
  }
  func.func @transform_4(%arg0: i32) -> (i32, i32) {
    %c0_i32 = arith.constant 0 : i32
    %c0_i32_0 = arith.constant 0 : i32
    %c0_i32_1 = arith.constant 0 : i32
    return %c0_i32, %c0_i32_0 : i32, i32
  }
  func.func @transform_5(%arg0: i32) -> (i32, i32) {
    %c0_i32 = arith.constant 0 : i32
    %c0_i32_0 = arith.constant 0 : i32
    %c0_i32_1 = arith.constant 0 : i32
    return %c0_i32, %c0_i32_0 : i32, i32
  }
  func.func @transform_6(%arg0: i32) -> (i32, i32) {
    %c0_i32 = arith.constant 0 : i32
    %c0_i32_0 = arith.constant 0 : i32
    %c0_i32_1 = arith.constant 0 : i32
    return %c0_i32, %c0_i32_0 : i32, i32
  }
  func.func @transform_7(%arg0: i32) -> (i32, i32) {
    %c0_i32 = arith.constant 0 : i32
    %c0_i32_0 = arith.constant 0 : i32
    %c0_i32_1 = arith.constant 0 : i32
    return %c0_i32, %c0_i32_0 : i32, i32
  }
  func.func @transform_8(%arg0: i32) -> (i32, i32) {
    %c0_i32 = arith.constant 0 : i32
    %c0_i32_0 = arith.constant 0 : i32
    %c0_i32_1 = arith.constant 0 : i32
    return %c0_i32, %c0_i32_0 : i32, i32
  }
  func.func @transform_9(%arg0: i32) -> (i32, i32) {
    %c0_i32 = arith.constant 0 : i32
    %c0_i32_0 = arith.constant 0 : i32
    %c0_i32_1 = arith.constant 0 : i32
    return %c0_i32, %c0_i32_0 : i32, i32
  }
}

</mosaic_0001>

<bundles_post_ra>
// kernel: tpu_custom_call.1
= control target key start
LH: loop header
LB: loop body
LE: loop exit
PB: predicated region body
PF: predicated region fallthrough
CT: control target
= control target key end

     0   :  { %s3161_s0 = inlined_call_operand.vmem [shape: f32[64,8], index: 0, kind: input, shape index: {}]   ;;  %s3162_s1 = inlined_call_operand.vmem [shape: f32[8,128], index: 1, kind: input, shape index: {}]   ;;  %s3163_s2 = inlined_call_operand.vmem [shape: f32[32,128], index: 2, kind: input, shape index: {}]   ;;  %s3164_s3 = inlined_call_operand.vmem [shape: f32[1,128], index: 3, kind: input, shape index: {}]   ;;  %s3165_s4 = inlined_call_operand.vmem [shape: f32[32,128], index: 4, kind: input, shape index: {}]   ;;  %s3166_s5 = inlined_call_operand.hbm [shape: f32[32,128], index: 5, kind: input, shape index: {}]   ;;  %s3167_s6 = inlined_call_operand.vmem [shape: f32[1,128], index: 6, kind: input, shape index: {}]   ;;  %s3168_s7 = inlined_call_operand.vmem [shape: f32[1,32], index: 7, kind: input, shape index: {}]   ;;  %s3169_s8 = inlined_call_operand.<no memory space> [shape: f32[1,1], index: 8, kind: input, shape index: {}]   ;;  %s3170_s9 = inlined_call_operand.vmem [shape: f32[64,1], index: 9, kind: output, shape index: {}]  }
   0x1   :  { %v14_v0 = vstv %s3169_s8 }
   0x2   :  { %15 = vst [vmem:[#allocation4] sm:$0x1] %v14_v0 }
   0x3   :  { %16 = vsyncpa [#allocation6], 0  ;;  %s2715_s11 = smov [#allocation5]   ;;  %s2691_s15 = scalar_lea.hbm %s3166_s5, 512 }
   0x4   :  { %s32_s12 = sshll.u32 %s2715_s11, 4  ;;  %p2692_p0 = scmp.ne.s32.totalorder %s3166_s5, %s2691_s15  ;;  %s33_s12 = int_to_ptr.vmem [resolvable:$true] %s32_s12 }
   0x5   :  { %p2695_p1 = scmp.lt.u32.totalorder %s2691_s15, %s3166_s5 }
   0x7   :  { %p2697_p2 = pnand %p2695_p1, %p2692_p0 }
   0x9   :  { %2700 = shalt.err (!%p2697_p2)
}
   0xa   :  { %s2701_s8 = scalar_lea.vmem %s33_s12, 512  ;;  %p2706_p4 = scmp.lt.s32.totalorder %s33_s12, %s33_s12 }
   0xb   :  { %p2702_p3 = scmp.ne.s32.totalorder %s33_s12, %s2701_s8  ;;  %p2707_p5 = scmp.lt.s32.totalorder %s2701_s8, %s2701_s8 }
   0xd   :  { %p2708_p6 = por %p2707_p5, %p2706_p4 }
   0xf   :  { %p2709_p7 = pnand %p2708_p6, %p2702_p3 }
  0x11   :  { %2712 = shalt.err (!%p2709_p7)
}
  0x12   :  { %s2716_s20 = smov 128   ;;  %s2717_s21 = smov 8  }
  0x13   :  { %38 = dma.hbm_to_vmem [thread:$0]  %s3166_s5, 512, %s33_s12, [#allocation6], %s2716_s20, %s2716_s20, %s2717_s21  }
  0x14   :  { %2713 = dma.done.wait [#allocation6], 512  }
  0x15   :  { %2714 = vsyncadd [#allocation6], 4294966784  ;;  %v2718_v1 = vmov 0.0|0.0   ;;  %vm2719_vm0 = vmmov 0   ;;  %v2720_v2 = vmov 0.0   ;;  %vm68_vm1 = vcmask 64512  }
  0x16   :  { %2451 = vmatprep.subr.bf16.mxu1 %v2718_v1  ;;  %2263 = vmatprep.mubr.msk.f32.mxu1 %vm2719_vm0, %v2720_v2  ;;  %v57_v3 = vld [vmem:[%s3163_s2] sm:$0xff]  ;;  %v58_v4 = vld [vmem:[%s3163_s2 + $0x8] sm:$0xff]  ;;  %v59_v9 = vld [vmem:[%s3163_s2 + $0x10] sm:$0xff]  ;;  %s2721_s16 = smov 64   ;;  %vm207_vm2 = vcmask 261120   ;;  %vm2076_vm3 = vcmask 7168  }
  0x17   :  { %v56_v5 = vld [vmem:[%s3162_s1] sm:$0xff]  ;;  %v2800_v6 = vpack.c.bf16 %v58_v4, %v57_v3  ;;  %v49_v8 = vld [vmem:[%s3161_s0 + $0x8] sm:$0xff]  ;;  %v60_v10 = vld [vmem:[%s3163_s2 + $0x18] sm:$0xff] }
  0x18   :  { %2241 = vmatprep.subr.mxu0 %v56_v5  ;;  %v48_v7 = vld [vmem:[%s3161_s0] sm:$0xff]  ;;  %v2817_v11 = vpack.c.bf16 %v60_v10, %v59_v9  ;;  %v50_v47 = vld [vmem:[%s3161_s0 + $0x10] sm:$0xff]  ;;  %v51_v48 = vld [vmem:[%s3161_s0 + $0x18] sm:$0xff] }
  0x19   :  { %2242 = vmatpush3.msra.mxu0 %v56_v5  ;;  %2243 = vmatprep.mubr.msk.f32.mxu0 %vm68_vm1, %v48_v7  ;;  %v2837_v13 = vld [vmem:[%s3164_s3] ss:$0 sm:$0xff]  ;;  %s2722_s3 = smov 32   ;;  %v53_v50 = vld [vmem:[%s3161_s0 + $0x28] sm:$0xff]  ;;  %v54_v51 = vld [vmem:[%s3161_s0 + $0x30] sm:$0xff] }
  0x1a   :  { %2453 = vmatpush3.bf16.msra.mxu1 %v2800_v6  ;;  %2244 = vmatmul.mubr.msk.f32.vlgmr.msra.gmra.mrb[0].mxu0 %vm68_vm1, %v49_v8  ;;  %v52_v49 = vld [vmem:[%s3161_s0 + $0x20] sm:$0xff]  ;;  %v55_v52 = vld [vmem:[%s3161_s0 + $0x38] sm:$0xff] }
  0x1b   :  { %2454 = vmatprep.subr.bf16.mxu1 %v2718_v1  ;;  %2463 = vmatprep.subr.bf16.mxu0 %v2718_v1 }
  0x1c   :  { %2465 = vmatpush3.bf16.msra.mxu0 %v2800_v6  ;;  %2246 = vmatprep.mubr.msk.f32.mxu0 %vm68_vm1, %v50_v47 }
  0x1d   :  { %2466 = vmatprep.subr.bf16.mxu0 %v2718_v1 }
  0x1e   :  { %2456 = vmatpush3.bf16.msra.mxu1 %v2817_v11  ;;  %2247 = vmatmul.mubr.msk.f32.gmra.mrb[2].mxu0 %vm68_vm1, %v51_v48 }
  0x1f   :  { %2457 = vmatprep.subr.bf16.mxu1 %v2718_v1  ;;  %2249 = vmatprep.mubr.msk.f32.mxu0 %vm68_vm1, %v52_v49 }
  0x20   :  { %2468 = vmatpush3.bf16.msra.mxu0 %v2817_v11 }
  0x21   :  { %2264 = vmatmul.mubr.f32.vlgmr.msra.gmra.mrb[0].mxu1 %v2720_v2  ;;  %2475 = vmatprep.subr.bf16.mxu0 %v2718_v1 }
  0x22   :  { %2459 = vmatpush3.bf16.msra.mxu1 %v2800_v6  ;;  %2274 = vmatprep.mubr.msk.f32.mxu1 %vm2719_vm0, %v2720_v2 }
  0x23   :  { %2460 = vmatprep.subr.bf16.mxu1 %v2718_v1  ;;  %2250 = vmatmul.mubr.msk.f32.gmra.mrb[4].mxu0 %vm68_vm1, %v53_v50 }
  0x24   :  { %2252 = vmatprep.mubr.msk.f32.mxu0 %vm68_vm1, %v54_v51 }
  0x26   :  { %2462 = vmatpush3.bf16.msra.mxu1 %v2817_v11 }
  0x27   :  { %2469 = vmatprep.subr.bf16.mxu1 %v2718_v1  ;;  %2253 = vmatmul.mubr.msk.f32.gmra.mrb[6].mxu0 %vm68_vm1, %v55_v52 }
  0x28   :  { %2285 = vmatprep.mubr.msk.f32.mxu0 %vm2719_vm0, %v2720_v2 }
  0xed   :  { %v2245_v12 = vpop.f32.mrb[0].mxu0 }
  0xee   :  { %v159_v14 = vpop.f32.mrb[1].mxu0  ;;  %v165_v33 = vadd.f32 %v2245_v12, %v2837_v13 }
  0xef   :  { %v160_v15 = vadd.f32 %v2837_v13, %v159_v14 }
  0xf1   :  { %v2248_v56 = vpop.f32.mrb[2].mxu0 }
  0xf2   :  { %v169_v57 = vpop.f32.mrb[3].mxu0 }
  0xf3   :  { %v170_v63 = vadd.f32 %v2837_v13, %v169_v57 }
  0xf4   :  { %v277_v16 = vpop.f32.mrb[0].mxu1 }
  0xf5   :  { %v281_v17 = vadd.f32 %v277_v16, %v160_v15  ;;  %v2265_v18 = vpop.f32.mrb[1].mxu1 }
  0xf6   :  { %v2883_v58 = vpop.f32.mrb[4].mxu0 }
  0xf7   :  { %2563 = vtanh.f32 %v281_v17  ;;  %v2099_v20 = vmul.f32 -1.442695, %v281_v17  ;;  %v2885_v59 = vpop.f32.mrb[5].mxu0 }
  0xf9   :  { %2565 = vpow2.f32 %v2099_v20 }
  0xfa   :  { %v2887_v60 = vpop.f32.mrb[6].mxu0 }
  0xfb   :  { %v2889_v61 = vpop.f32.mrb[7].mxu0 }
 0x101   :  { %v2564_v19 = vpop.eup %2563 }
 0x102   :  { %291 = vrot.lane.b32.xlu0 %v2564_v19, %s2721_s16 }
 0x103   :  { %v2566_v21 = vpop.eup %2565 }
 0x104   :  { %v285_v22 = vadd.f32 1.0, %v2566_v21 }
 0x106   :  { %2567 = vrcp.f32 %v285_v22  ;;  %v175_v22 = vadd.f32 %v2248_v56, %v2837_v13 }
 0x110   :  { %v2568_v23 = vpop.eup %2567 }
 0x111   :  { %v289_v26 = vmul.f32 0.0, %v2568_v23 }
 0x174   :  { %v292_v24 = vpop.permute.xlu0 %291 }
 0x175   :  { %v294_v25 = vmul.f32 %v2568_v23, %v292_v24 }
 0x177   :  { %296 = vrot.lane.b32.xlu0 %v294_v25, %s2722_s3 }
 0x1e9   :  { %v297_v27 = vpop.permute.xlu0 %296 }
 0x1ea   :  { %v299_v28 = vadd.f32 %v297_v27, %v289_v26 }
 0x1ec   :  { %2569 = vtanh.f32 %v299_v28 }
 0x1f6   :  { %v2570_v29 = vpop.eup %2569 }
 0x1f7   :  { %302 = vrot.lane.b32.xlu1 %v2570_v29, %s2721_s16 }
 0x269   :  { %v303_v30 = vpop.permute.xlu1 %302 }
 0x26a   :  { %v305_v31 = vmul.f32 %v2568_v23, %v303_v30 }
 0x26c   :  { %307 = vrot.lane.b32.xlu1 %v305_v31, %s2722_s3 }
 0x2de   :  { %v308_v32 = vpop.permute.xlu1 %307 }
 0x2df   :  { %310 = vst.msk [vmem:[#allocation3] sm:$0xff] %vm207_vm2, %v308_v32  ;;  %2275 = vmatmul.mubr.msk.f32.vlgmr.msra.gmra.mrb[2].mxu1 %vm207_vm2, %v308_v32 }
 0x2e0   :  { %2471 = vmatpush3.bf16.msra.mxu1 %v2800_v6  ;;  %2296 = vmatprep.mubr.msk.f32.mxu1 %vm2719_vm0, %v2720_v2 }
 0x2e1   :  { %2472 = vmatprep.subr.bf16.mxu1 %v2718_v1 }
 0x2e4   :  { %2474 = vmatpush3.bf16.msra.mxu1 %v2817_v11 }
 0x2e5   :  { %2481 = vmatprep.subr.bf16.mxu1 %v2718_v1 }
 0x3b2   :  { %v380_v34 = vpop.f32.mrb[2].mxu1 }
 0x3b3   :  { %v384_v35 = vadd.f32 %v380_v34, %v165_v33  ;;  %v2276_v36 = vpop.f32.mrb[3].mxu1 }
 0x3b5   :  { %2571 = vtanh.f32 %v384_v35  ;;  %v2101_v38 = vmul.f32 -1.442695, %v384_v35 }
 0x3b7   :  { %2573 = vpow2.f32 %v2101_v38 }
 0x3bf   :  { %v2572_v37 = vpop.eup %2571 }
 0x3c0   :  { %394 = vrot.lane.b32.xlu0 %v2572_v37, %s2721_s16 }
 0x3c1   :  { %v2574_v39 = vpop.eup %2573 }
 0x3c2   :  { %v388_v40 = vadd.f32 1.0, %v2574_v39 }
 0x3c4   :  { %2575 = vrcp.f32 %v388_v40  ;;  %v180_v40 = vadd.f32 %v2837_v13, %v2885_v59  ;;  %v185_v59 = vadd.f32 %v2883_v58, %v2837_v13 }
 0x3ce   :  { %v2576_v41 = vpop.eup %2575 }
 0x3cf   :  { %v392_v44 = vmul.f32 %v2576_v41, %v299_v28 }
 0x432   :  { %v395_v42 = vpop.permute.xlu0 %394 }
 0x433   :  { %v397_v43 = vmul.f32 %v2576_v41, %v395_v42 }
 0x435   :  { %399 = vrot.lane.b32.xlu1 %v397_v43, %s2722_s3 }
 0x4a7   :  { %v400_v45 = vpop.permute.xlu1 %399 }
 0x4a8   :  { %v402_v46 = vadd.f32 %v400_v45, %v392_v44 }
 0x4aa   :  { %2577 = vtanh.f32 %v402_v46 }
 0x4b4   :  { %v2578_v53 = vpop.eup %2577 }
 0x4b5   :  { %405 = vrot.lane.b32.xlu0 %v2578_v53, %s2721_s16 }
 0x527   :  { %v406_v54 = vpop.permute.xlu0 %405 }
 0x528   :  { %v408_v55 = vmul.f32 %v2576_v41, %v406_v54 }
 0x52a   :  { %410 = vrot.lane.b32.xlu1 %v408_v55, %s2722_s3 }
 0x59c   :  { %v411_v62 = vpop.permute.xlu1 %410 }
 0x59d   :  { %413 = vst.msk [vmem:[#allocation3 + $0x8] sm:$0xff] %vm207_vm2, %v411_v62  ;;  %2286 = vmatmul.mubr.msk.f32.vlgmr.msra.gmra.mrb[8].mxu0 %vm207_vm2, %v411_v62 }
 0x59e   :  { %2477 = vmatpush3.bf16.msra.mxu0 %v2800_v6  ;;  %2307 = vmatprep.mubr.msk.f32.mxu0 %vm2719_vm0, %v2720_v2 }
 0x59f   :  { %2478 = vmatprep.subr.bf16.mxu0 %v2718_v1 }
 0x5a2   :  { %2480 = vmatpush3.bf16.msra.mxu0 %v2817_v11 }
 0x5a3   :  { %2487 = vmatprep.subr.bf16.mxu0 %v2718_v1 }
 0x670   :  { %v483_v0 = vpop.f32.mrb[8].mxu0 }
 0x671   :  { %v487_v3 = vadd.f32 %v483_v0, %v170_v63  ;;  %v2287_v4 = vpop.f32.mrb[9].mxu0 }
 0x673   :  { %2579 = vtanh.f32 %v487_v3  ;;  %v2103_v7 = vmul.f32 -1.442695, %v487_v3 }
 0x675   :  { %2581 = vpow2.f32 %v2103_v7 }
 0x67d   :  { %v2580_v5 = vpop.eup %2579 }
 0x67e   :  { %497 = vrot.lane.b32.xlu0 %v2580_v5, %s2721_s16 }
 0x67f   :  { %v2582_v8 = vpop.eup %2581 }
 0x680   :  { %v491_v9 = vadd.f32 1.0, %v2582_v8 }
 0x682   :  { %2583 = vrcp.f32 %v491_v9 }
 0x68c   :  { %v2584_v10 = vpop.eup %2583 }
 0x68d   :  { %v495_v15 = vmul.f32 %v2584_v10, %v402_v46 }
 0x6f0   :  { %v498_v12 = vpop.permute.xlu0 %497 }
 0x6f1   :  { %v500_v14 = vmul.f32 %v2584_v10, %v498_v12  ;;  %v1040_v12 = vld [vmem:[%s3165_s4] sm:$0xff] }
 0x6f3   :  { %502 = vrot.lane.b32.xlu1 %v500_v14, %s2722_s3  ;;  %v1041_v14 = vld [vmem:[%s3165_s4 + $0x8] sm:$0xff] }
 0x765   :  { %v503_v16 = vpop.permute.xlu1 %502 }
 0x766   :  { %v505_v17 = vadd.f32 %v503_v16, %v495_v15  ;;  %v2499_v15 = vpack.c.bf16 %v1041_v14, %v1040_v12 }
 0x768   :  { %2585 = vtanh.f32 %v505_v17 }
 0x772   :  { %v2586_v18 = vpop.eup %2585 }
 0x773   :  { %508 = vrot.lane.b32.xlu0 %v2586_v18, %s2721_s16 }
 0x7e5   :  { %v509_v19 = vpop.permute.xlu0 %508 }
 0x7e6   :  { %v511_v20 = vmul.f32 %v2584_v10, %v509_v19  ;;  %v1042_v19 = vld [vmem:[%s3165_s4 + $0x10] sm:$0xff] }
 0x7e8   :  { %513 = vrot.lane.b32.xlu1 %v511_v20, %s2722_s3  ;;  %v1043_v20 = vld [vmem:[%s3165_s4 + $0x18] sm:$0xff] }
 0x85a   :  { %v514_v21 = vpop.permute.xlu1 %513 }
 0x85b   :  { %516 = vst.msk [vmem:[#allocation3 + $0x10] sm:$0xff] %vm207_vm2, %v514_v21  ;;  %2297 = vmatmul.mubr.msk.f32.vlgmr.msra.gmra.mrb[4].mxu1 %vm207_vm2, %v514_v21  ;;  %v2503_v21 = vpack.c.bf16 %v1043_v20, %v1042_v19 }
 0x85c   :  { %2483 = vmatpush3.bf16.msra.mxu1 %v2800_v6  ;;  %2318 = vmatprep.mubr.msk.f32.mxu1 %vm2719_vm0, %v2720_v2 }
 0x85d   :  { %2484 = vmatprep.subr.bf16.mxu1 %v2718_v1 }
 0x860   :  { %2486 = vmatpush3.bf16.msra.mxu1 %v2817_v11 }
 0x861   :  { %2493 = vmatprep.subr.bf16.mxu1 %v2718_v1 }
 0x92e   :  { %v586_v23 = vpop.f32.mrb[4].mxu1 }
 0x92f   :  { %v590_v24 = vadd.f32 %v586_v23, %v175_v22  ;;  %v2298_v25 = vpop.f32.mrb[5].mxu1  ;;  %v1032_v23 = vld [vmem:[#allocation3] sm:$0xff] }
 0x930   :  { %v1034_v25 = vld [vmem:[#allocation3 + $0x10] sm:$0xff] }
 0x931   :  { %2587 = vtanh.f32 %v590_v24  ;;  %v2105_v27 = vmul.f32 -1.442695, %v590_v24  ;;  %v1033_v24 = vld [vmem:[#allocation3 + $0x8] sm:$0xff] }
 0x933   :  { %2589 = vpow2.f32 %v2105_v27 }
 0x93b   :  { %v2588_v26 = vpop.eup %2587 }
 0x93c   :  { %600 = vrot.lane.b32.xlu0 %v2588_v26, %s2721_s16 }
 0x93d   :  { %v2590_v28 = vpop.eup %2589 }
 0x93e   :  { %v594_v29 = vadd.f32 1.0, %v2590_v28 }
 0x940   :  { %2591 = vrcp.f32 %v594_v29  ;;  %v190_v29 = vadd.f32 %v2837_v13, %v2889_v61 }
 0x94a   :  { %v2592_v30 = vpop.eup %2591 }
 0x94b   :  { %v598_v33 = vmul.f32 %v2592_v30, %v505_v17 }
 0x9ae   :  { %v601_v31 = vpop.permute.xlu0 %600 }
 0x9af   :  { %v603_v32 = vmul.f32 %v2592_v30, %v601_v31 }
 0x9b1   :  { %605 = vrot.lane.b32.xlu1 %v603_v32, %s2722_s3 }
 0xa23   :  { %v606_v34 = vpop.permute.xlu1 %605 }
 0xa24   :  { %v608_v35 = vadd.f32 %v606_v34, %v598_v33 }
 0xa26   :  { %2593 = vtanh.f32 %v608_v35 }
 0xa30   :  { %v2594_v36 = vpop.eup %2593 }
 0xa31   :  { %611 = vrot.lane.b32.xlu0 %v2594_v36, %s2721_s16 }
 0xaa3   :  { %v612_v37 = vpop.permute.xlu0 %611 }
 0xaa4   :  { %v614_v38 = vmul.f32 %v2592_v30, %v612_v37 }
 0xaa6   :  { %616 = vrot.lane.b32.xlu1 %v614_v38, %s2722_s3 }
 0xb18   :  { %v617_v39 = vpop.permute.xlu1 %616 }
 0xb19   :  { %619 = vst.msk [vmem:[#allocation3 + $0x18] sm:$0xff] %vm207_vm2, %v617_v39  ;;  %2308 = vmatmul.mubr.msk.f32.vlgmr.msra.gmra.mrb[10].mxu0 %vm207_vm2, %v617_v39 }
 0xb1a   :  { %2489 = vmatpush3.bf16.msra.mxu0 %v2800_v6  ;;  %2329 = vmatprep.mubr.msk.f32.mxu0 %vm2719_vm0, %v2720_v2 }
 0xb1b   :  { %2490 = vmatprep.subr.bf16.mxu0 %v2718_v1 }
 0xb1e   :  { %2492 = vmatpush3.bf16.msra.mxu0 %v2817_v11 }
 0xb1f   :  { %2500 = vmatprep.subr.bf16.mxu0 %v2499_v15 }
 0xb20   :  { %v1035_v26 = vld [vmem:[#allocation3 + $0x18] sm:$0xff] }
 0xbec   :  { %v689_v41 = vpop.f32.mrb[10].mxu0 }
 0xbed   :  { %v693_v42 = vadd.f32 %v689_v41, %v180_v40  ;;  %v2309_v43 = vpop.f32.mrb[11].mxu0 }
 0xbef   :  { %2595 = vtanh.f32 %v693_v42  ;;  %v2107_v45 = vmul.f32 -1.442695, %v693_v42 }
 0xbf1   :  { %2597 = vpow2.f32 %v2107_v45 }
 0xbf9   :  { %v2596_v44 = vpop.eup %2595 }
 0xbfa   :  { %703 = vrot.lane.b32.xlu0 %v2596_v44, %s2721_s16 }
 0xbfb   :  { %v2598_v46 = vpop.eup %2597 }
 0xbfc   :  { %v697_v47 = vadd.f32 1.0, %v2598_v46 }
 0xbfe   :  { %2599 = vrcp.f32 %v697_v47 }
 0xc08   :  { %v2600_v48 = vpop.eup %2599 }
 0xc09   :  { %v701_v51 = vmul.f32 %v2600_v48, %v608_v35 }
 0xc6c   :  { %v704_v49 = vpop.permute.xlu0 %703 }
 0xc6d   :  { %v706_v50 = vmul.f32 %v2600_v48, %v704_v49  ;;  %v1044_v49 = vld [vmem:[#allocation5] sm:$0xff] }
 0xc6f   :  { %708 = vrot.lane.b32.xlu1 %v706_v50, %s2722_s3  ;;  %v1045_v50 = vld [vmem:[#allocation5 + $0x8] sm:$0xff] }
 0xce1   :  { %v709_v52 = vpop.permute.xlu1 %708 }
 0xce2   :  { %v711_v53 = vadd.f32 %v709_v52, %v701_v51  ;;  %v2983_v51 = vpack.c.bf16 %v1045_v50, %v1044_v49  ;;  %v1046_v52 = vld [vmem:[#allocation5 + $0x10] sm:$0xff] }
 0xce4   :  { %2601 = vtanh.f32 %v711_v53 }
 0xcee   :  { %v2602_v54 = vpop.eup %2601 }
 0xcef   :  { %714 = vrot.lane.b32.xlu0 %v2602_v54, %s2721_s16 }
 0xd61   :  { %v715_v55 = vpop.permute.xlu0 %714 }
 0xd62   :  { %v717_v56 = vmul.f32 %v2600_v48, %v715_v55 }
 0xd64   :  { %719 = vrot.lane.b32.xlu1 %v717_v56, %s2722_s3 }
 0xdd6   :  { %v720_v57 = vpop.permute.xlu1 %719 }
 0xdd7   :  { %722 = vst.msk [vmem:[#allocation3 + $0x20] sm:$0xff] %vm207_vm2, %v720_v57  ;;  %2319 = vmatmul.mubr.msk.f32.vlgmr.msra.gmra.mrb[6].mxu1 %vm207_vm2, %v720_v57 }
 0xdd8   :  { %2495 = vmatpush3.bf16.msra.mxu1 %v2800_v6  ;;  %2340 = vmatprep.mubr.msk.f32.mxu1 %vm2719_vm0, %v2720_v2 }
 0xdd9   :  { %2496 = vmatprep.subr.bf16.mxu1 %v2718_v1 }
 0xddc   :  { %2498 = vmatpush3.bf16.msra.mxu1 %v2817_v11 }
 0xddd   :  { %2507 = vmatprep.subr.bf16.mxu1 %v2718_v1 }
 0xdde   :  { %v1036_v27 = vld [vmem:[#allocation3 + $0x20] sm:$0xff] }
 0xeaa   :  { %v792_v62 = vpop.f32.mrb[6].mxu1 }
 0xeab   :  { %v796_v63 = vadd.f32 %v792_v62, %v185_v59  ;;  %v2320_v0 = vpop.f32.mrb[7].mxu1  ;;  %v195_v62 = vadd.f32 %v2887_v60, %v2837_v13 }
 0xead   :  { %2603 = vtanh.f32 %v796_v63  ;;  %v2109_v6 = vmul.f32 -1.442695, %v796_v63 }
 0xeaf   :  { %2605 = vpow2.f32 %v2109_v6  ;;  %v3013_v6 = vld [vmem:[%s3167_s6] ss:$0 sm:$0xff] }
 0xeb7   :  { %v2604_v3 = vpop.eup %2603 }
 0xeb8   :  { %806 = vrot.lane.b32.xlu0 %v2604_v3, %s2721_s16 }
 0xeb9   :  { %v2606_v4 = vpop.eup %2605 }
 0xeba   :  { %v800_v5 = vadd.f32 1.0, %v2606_v4 }
 0xebc   :  { %2607 = vrcp.f32 %v800_v5 }
 0xec6   :  { %v2608_v7 = vpop.eup %2607 }
 0xec7   :  { %v804_v9 = vmul.f32 %v2608_v7, %v711_v53  ;;  %v1047_v53 = vld [vmem:[#allocation5 + $0x18] sm:$0xff] }
 0xec8   :  { %v2987_v54 = vpack.c.bf16 %v1047_v53, %v1046_v52 }
 0xf2a   :  { %v807_v8 = vpop.permute.xlu0 %806 }
 0xf2b   :  { %v809_v11 = vmul.f32 %v2608_v7, %v807_v8 }
 0xf2d   :  { %811 = vrot.lane.b32.xlu1 %v809_v11, %s2722_s3 }
 0xf9f   :  { %v812_v10 = vpop.permute.xlu1 %811 }
 0xfa0   :  { %v814_v58 = vadd.f32 %v812_v10, %v804_v9 }
 0xfa2   :  { %2609 = vtanh.f32 %v814_v58 }
 0xfac   :  { %v2610_v16 = vpop.eup %2609 }
 0xfad   :  { %817 = vrot.lane.b32.xlu0 %v2610_v16, %s2721_s16 }
0x101f   :  { %v818_v17 = vpop.permute.xlu0 %817 }
0x1020   :  { %v820_v18 = vmul.f32 %v2608_v7, %v818_v17 }
0x1022   :  { %822 = vrot.lane.b32.xlu1 %v820_v18, %s2722_s3 }
0x1094   :  { %v823_v22 = vpop.permute.xlu1 %822 }
0x1095   :  { %825 = vst.msk [vmem:[#allocation3 + $0x28] sm:$0xff] %vm207_vm2, %v823_v22  ;;  %2330 = vmatmul.mubr.msk.f32.vlgmr.msra.gmra.mrb[12].mxu0 %vm207_vm2, %v823_v22 }
0x1096   :  { %2502 = vmatpush3.bf16.msra.mxu0 %v2499_v15  ;;  %2351 = vmatprep.mubr.msk.f32.mxu0 %vm207_vm2, %v1032_v23 }
0x1097   :  { %2504 = vmatprep.subr.bf16.mxu0 %v2503_v21 }
0x109a   :  { %2506 = vmatpush3.bf16.msra.mxu0 %v2503_v21 }
0x109b   :  { %2519 = vmatprep.subr.bf16.mxu0 %v2718_v1 }
0x109c   :  { %v1037_v28 = vld [vmem:[#allocation3 + $0x28] sm:$0xff] }
0x109d   :  { %2352 = vmatmul.mubr.msk.f32.vlgmr.msra.gmra.mrb[14].mxu0 %vm207_vm2, %v1033_v24 }
0x109e   :  { %2354 = vmatprep.mubr.msk.f32.mxu0 %vm207_vm2, %v1034_v25  ;;  %2521 = vmatpush3.bf16.msra.mxu0 %v2983_v51 }
0x109f   :  { %2522 = vmatprep.subr.bf16.mxu0 %v2718_v1 }
0x10a1   :  { %2355 = vmatmul.mubr.msk.f32.gmra.mrb[16].mxu0 %vm207_vm2, %v1035_v26 }
0x10a2   :  { %2357 = vmatprep.mubr.msk.f32.mxu0 %vm207_vm2, %v1036_v27  ;;  %2524 = vmatpush3.bf16.msra.mxu0 %v2987_v54 }
0x10a3   :  { %2531 = vmatprep.subr.bf16.mxu0 %v2718_v1 }
0x10a5   :  { %2358 = vmatmul.mubr.msk.f32.gmra.mrb[18].mxu0 %vm207_vm2, %v1037_v28 }
0x1168   :  { %v895_v30 = vpop.f32.mrb[12].mxu0 }
0x1169   :  { %v899_v31 = vadd.f32 %v895_v30, %v190_v29  ;;  %v2331_v32 = vpop.f32.mrb[13].mxu0 }
0x116b   :  { %2611 = vtanh.f32 %v899_v31  ;;  %v2111_v40 = vmul.f32 -1.442695, %v899_v31 }
0x116d   :  { %2613 = vpow2.f32 %v2111_v40 }
0x1170   :  { %v2967_v33 = vpop.f32.mrb[14].mxu0 }
0x1171   :  { %v1145_v34 = vpop.f32.mrb[15].mxu0 }
0x1172   :  { %v1146_v4 = vadd.f32 %v3013_v6, %v1145_v34 }
0x1174   :  { %v2969_v35 = vpop.f32.mrb[16].mxu0 }
0x1175   :  { %v2612_v36 = vpop.eup %2611  ;;  %v2971_v37 = vpop.f32.mrb[17].mxu0 }
0x1176   :  { %909 = vrot.lane.b32.xlu0 %v2612_v36, %s2721_s16  ;;  %v1151_v36 = vadd.f32 %v2967_v33, %v3013_v6 }
0x1177   :  { %v2614_v61 = vpop.eup %2613 }
0x1178   :  { %v2974_v38 = vpop.f32.mrb[18].mxu0  ;;  %v903_v41 = vadd.f32 1.0, %v2614_v61 }
0x1179   :  { %v2976_v39 = vpop.f32.mrb[19].mxu0 }
0x117a   :  { %2615 = vrcp.f32 %v903_v41 }
0x1184   :  { %v2616_v42 = vpop.eup %2615 }
0x1185   :  { %v907_v45 = vmul.f32 %v2616_v42, %v814_v58 }
0x11e8   :  { %v910_v43 = vpop.permute.xlu0 %909 }
0x11e9   :  { %v912_v44 = vmul.f32 %v2616_v42, %v910_v43 }
0x11eb   :  { %914 = vrot.lane.b32.xlu1 %v912_v44, %s2722_s3 }
0x125d   :  { %v915_v46 = vpop.permute.xlu1 %914 }
0x125e   :  { %v2979_v47 = vadd.f32 %v915_v46, %v907_v45 }
0x1260   :  { %2617 = vtanh.f32 %v2979_v47 }
0x126a   :  { %v2618_v48 = vpop.eup %2617 }
0x126b   :  { %920 = vrot.lane.b32.xlu0 %v2618_v48, %s2721_s16 }
0x12dd   :  { %v921_v55 = vpop.permute.xlu0 %920 }
0x12de   :  { %v923_v56 = vmul.f32 %v2616_v42, %v921_v55 }
0x12e0   :  { %925 = vrot.lane.b32.xlu1 %v923_v56, %s2722_s3 }
0x1352   :  { %v926_v57 = vpop.permute.xlu1 %925 }
0x1353   :  { %928 = vst.msk [vmem:[#allocation3 + $0x30] sm:$0xff] %vm207_vm2, %v926_v57  ;;  %2341 = vmatmul.mubr.msk.f32.vlgmr.msra.gmra.mrb[8].mxu1 %vm207_vm2, %v926_v57 }
0x1354   :  { %2509 = vmatpush3.bf16.msra.mxu1 %v2983_v51  ;;  %2371 = vmatprep.mubr.msk.f32.mxu1 %vm2719_vm0, %v2720_v2 }
0x1355   :  { %2510 = vmatprep.subr.bf16.mxu1 %v2718_v1 }
0x1358   :  { %2512 = vmatpush3.bf16.msra.mxu1 %v2987_v54 }
0x1359   :  { %2513 = vmatprep.subr.bf16.mxu1 %v2718_v1 }
0x135a   :  { %v1038_v59 = vld [vmem:[#allocation3 + $0x30] sm:$0xff] }
0x135b   :  { %2372 = vmatmul.mubr.f32.vlgmr.msra.gmra.mrb[10].mxu1 %v2720_v2  ;;  %2360 = vmatprep.mubr.msk.f32.mxu0 %vm207_vm2, %v1038_v59 }
0x135c   :  { %2515 = vmatpush3.bf16.msra.mxu1 %v2983_v51  ;;  %2382 = vmatprep.mubr.msk.f32.mxu1 %vm2719_vm0, %v2720_v2 }
0x135d   :  { %2516 = vmatprep.subr.bf16.mxu1 %v2718_v1 }
0x1360   :  { %2518 = vmatpush3.bf16.msra.mxu1 %v2987_v54 }
0x1361   :  { %2525 = vmatprep.subr.bf16.mxu1 %v2718_v1 }
0x1426   :  { %v998_v63 = vpop.f32.mrb[8].mxu1 }
0x1427   :  { %v1002_v0 = vadd.f32 %v998_v63, %v195_v62  ;;  %v2342_v3 = vpop.f32.mrb[9].mxu1 }
0x1429   :  { %v2113_v19 = vmul.f32 -1.442695, %v1002_v0 }
0x142e   :  { %v1259_v5 = vpop.f32.mrb[10].mxu1 }
0x142f   :  { %v1263_v7 = vadd.f32 %v1259_v5, %v1146_v4  ;;  %v2373_v8 = vpop.f32.mrb[11].mxu1 }
0x1431   :  { %2619 = vtanh.f32 %v1263_v7  ;;  %v2123_v9 = vmul.f32 -1.442695, %v1263_v7 }
0x1433   :  { %2621 = vpow2.f32 %v2123_v9 }
0x143b   :  { %v2620_v11 = vpop.eup %2619 }
0x143c   :  { %1273 = vrot.lane.b32.xlu0 %v2620_v11, %s2721_s16 }
0x143d   :  { %v2622_v13 = vpop.eup %2621 }
0x143e   :  { %v1267_v60 = vadd.f32 1.0, %v2622_v13 }
0x1440   :  { %2623 = vrcp.f32 %v1267_v60 }
0x144a   :  { %v2624_v10 = vpop.eup %2623 }
0x144b   :  { %v1271_v14 = vmul.f32 0.0, %v2624_v10 }
0x14ae   :  { %v1274_v58 = vpop.permute.xlu0 %1273 }
0x14af   :  { %v1276_v12 = vmul.f32 %v2624_v10, %v1274_v58 }
0x14b1   :  { %1278 = vrot.lane.b32.xlu1 %v1276_v12, %s2722_s3 }
0x1523   :  { %v1279_v15 = vpop.permute.xlu1 %1278 }
0x1524   :  { %v1281_v16 = vadd.f32 %v1279_v15, %v1271_v14 }
0x1526   :  { %2625 = vtanh.f32 %v1281_v16 }
0x1527   :  { %2627 = vtanh.f32 %v1002_v0  ;;  %v1156_v0 = vadd.f32 %v3013_v6, %v2971_v37 }
0x1528   :  { %2629 = vpow2.f32 %v2113_v19 }
0x1530   :  { %v2626_v17 = vpop.eup %2625 }
0x1531   :  { %1284 = vrot.lane.b32.xlu0 %v2626_v17, %s2721_s16  ;;  %v2628_v18 = vpop.eup %2627 }
0x1532   :  { %v2630_v20 = vpop.eup %2629 }
0x1533   :  { %v1006_v21 = vadd.f32 1.0, %v2630_v20 }
0x1535   :  { %1012 = vrot.lane.b32.xlu0 %v2628_v18, %s2721_s16  ;;  %2631 = vrcp.f32 %v1006_v21  ;;  %v1161_v18 = vadd.f32 %v2969_v35, %v3013_v6 }
0x153f   :  { %v2632_v24 = vpop.eup %2631 }
0x1540   :  { %v1010_v28 = vmul.f32 %v2632_v24, %v2979_v47 }
0x15a3   :  { %v1285_v22 = vpop.permute.xlu0 %1284 }
0x15a4   :  { %v1287_v23 = vmul.f32 %v2624_v10, %v1285_v22 }
0x15a6   :  { %1289 = vrot.lane.b32.xlu1 %v1287_v23, %s2722_s3 }
0x15a7   :  { %v1013_v25 = vpop.permute.xlu0 %1012 }
0x15a8   :  { %v1015_v26 = vmul.f32 %v2632_v24, %v1013_v25 }
0x15aa   :  { %1017 = vrot.lane.b32.xlu0 %v1015_v26, %s2722_s3 }
0x1618   :  { %v1290_v27 = vpop.permute.xlu1 %1289 }
0x1619   :  { %1292 = vst.msk [vmem:[#allocation3] sm:$0xff] %vm207_vm2, %v1290_v27  ;;  %2383 = vmatmul.mubr.msk.f32.vlgmr.msra.gmra.mrb[12].mxu1 %vm207_vm2, %v1290_v27 }
0x161a   :  { %2527 = vmatpush3.bf16.msra.mxu1 %v2983_v51  ;;  %2404 = vmatprep.mubr.msk.f32.mxu1 %vm2719_vm0, %v2720_v2 }
0x161b   :  { %2528 = vmatprep.subr.bf16.mxu1 %v2718_v1 }
0x161c   :  { %v1018_v29 = vpop.permute.xlu0 %1017 }
0x161d   :  { %v1020_v30 = vadd.f32 %v1018_v29, %v1010_v28 }
0x161e   :  { %2530 = vmatpush3.bf16.msra.mxu1 %v2987_v54 }
0x161f   :  { %2633 = vtanh.f32 %v1020_v30  ;;  %2537 = vmatprep.subr.bf16.mxu1 %v2718_v1 }
0x1629   :  { %v2634_v31 = vpop.eup %2633 }
0x162a   :  { %1023 = vrot.lane.b32.xlu0 %v2634_v31, %s2721_s16 }
0x169c   :  { %v1024_v32 = vpop.permute.xlu0 %1023 }
0x169d   :  { %v1026_v34 = vmul.f32 %v2632_v24, %v1024_v32 }
0x169f   :  { %1028 = vrot.lane.b32.xlu0 %v1026_v34, %s2722_s3 }
0x16ec   :  { %v1362_v40 = vpop.f32.mrb[12].mxu1 }
0x16ed   :  { %v1366_v61 = vadd.f32 %v1362_v40, %v1151_v36  ;;  %v2384_v41 = vpop.f32.mrb[13].mxu1  ;;  %v1166_v40 = vadd.f32 %v3013_v6, %v2976_v39 }
0x16ef   :  { %2635 = vtanh.f32 %v1366_v61  ;;  %v2125_v45 = vmul.f32 -1.442695, %v1366_v61 }
0x16f1   :  { %2637 = vpow2.f32 %v2125_v45 }
0x16f9   :  { %v2636_v42 = vpop.eup %2635 }
0x16fa   :  { %1376 = vrot.lane.b32.xlu1 %v2636_v42, %s2721_s16 }
0x16fb   :  { %v2638_v46 = vpop.eup %2637 }
0x16fc   :  { %v1370_v33 = vadd.f32 1.0, %v2638_v46 }
0x16fe   :  { %2639 = vrcp.f32 %v1370_v33 }
0x1708   :  { %v2640_v47 = vpop.eup %2639 }
0x1709   :  { %v1374_v50 = vmul.f32 %v2640_v47, %v1281_v16 }
0x1711   :  { %v1029_v43 = vpop.permute.xlu0 %1028 }
0x1712   :  { %1031 = vst.msk [vmem:[#allocation3 + $0x38] sm:$0xff] %vm207_vm2, %v1029_v43 }
0x1719   :  { %v1039_v44 = vld [vmem:[#allocation3 + $0x38] sm:$0xff] }
0x171a   :  { %2361 = vmatmul.mubr.msk.f32.gmra.mrb[20].mxu0 %vm207_vm2, %v1039_v44 }
0x171b   :  { %2393 = vmatprep.mubr.msk.f32.mxu0 %vm2719_vm0, %v2720_v2 }
0x176c   :  { %v1377_v48 = vpop.permute.xlu1 %1376 }
0x176d   :  { %v1379_v49 = vmul.f32 %v2640_v47, %v1377_v48 }
0x176f   :  { %1381 = vrot.lane.b32.xlu1 %v1379_v49, %s2722_s3 }
0x17e1   :  { %v1382_v52 = vpop.permute.xlu1 %1381 }
0x17e2   :  { %v1384_v53 = vadd.f32 %v1382_v52, %v1374_v50 }
0x17e4   :  { %2641 = vtanh.f32 %v1384_v53 }
0x17ed   :  { %v3041_v55 = vpop.f32.mrb[20].mxu0 }
0x17ee   :  { %v2642_v56 = vpop.eup %2641  ;;  %v3043_v57 = vpop.f32.mrb[21].mxu0 }
0x17ef   :  { %1387 = vrot.lane.b32.xlu1 %v2642_v56, %s2721_s16 }
0x1861   :  { %v1388_v59 = vpop.permute.xlu1 %1387 }
0x1862   :  { %v1390_v62 = vmul.f32 %v2640_v47, %v1388_v59 }
0x1864   :  { %1392 = vrot.lane.b32.xlu1 %v1390_v62, %s2722_s3  ;;  %v1171_v62 = vadd.f32 %v2974_v38, %v3013_v6 }
0x18d6   :  { %v1393_v63 = vpop.permute.xlu1 %1392 }
0x18d7   :  { %1395 = vst.msk [vmem:[#allocation3 + $0x8] sm:$0xff] %vm207_vm2, %v1393_v63  ;;  %2394 = vmatmul.mubr.msk.f32.vlgmr.msra.gmra.mrb[22].mxu0 %vm207_vm2, %v1393_v63 }
0x18d8   :  { %2533 = vmatpush3.bf16.msra.mxu0 %v2983_v51  ;;  %2415 = vmatprep.mubr.msk.f32.mxu0 %vm2719_vm0, %v2720_v2 }
0x18d9   :  { %2534 = vmatprep.subr.bf16.mxu0 %v2718_v1 }
0x18dc   :  { %2536 = vmatpush3.bf16.msra.mxu0 %v2987_v54 }
0x18dd   :  { %2543 = vmatprep.subr.bf16.mxu0 %v2718_v1 }
0x19aa   :  { %v1465_v3 = vpop.f32.mrb[22].mxu0 }
0x19ab   :  { %v1469_v4 = vadd.f32 %v1465_v3, %v1156_v0  ;;  %v2395_v5 = vpop.f32.mrb[23].mxu0 }
0x19ad   :  { %2643 = vtanh.f32 %v1469_v4  ;;  %v2127_v8 = vmul.f32 -1.442695, %v1469_v4 }
0x19af   :  { %2645 = vpow2.f32 %v2127_v8 }
0x19b7   :  { %v2644_v7 = vpop.eup %2643 }
0x19b8   :  { %1479 = vrot.lane.b32.xlu0 %v2644_v7, %s2721_s16 }
0x19b9   :  { %v2646_v11 = vpop.eup %2645 }
0x19ba   :  { %v1473_v9 = vadd.f32 1.0, %v2646_v11 }
0x19bc   :  { %2647 = vrcp.f32 %v1473_v9 }
0x19c6   :  { %v2648_v13 = vpop.eup %2647 }
0x19c7   :  { %v1477_v58 = vmul.f32 %v2648_v13, %v1384_v53 }
0x1a2a   :  { %v1480_v60 = vpop.permute.xlu0 %1479 }
0x1a2b   :  { %v1482_v10 = vmul.f32 %v2648_v13, %v1480_v60 }
0x1a2d   :  { %1484 = vrot.lane.b32.xlu1 %v1482_v10, %s2722_s3 }
0x1a9f   :  { %v1485_v12 = vpop.permute.xlu1 %1484 }
0x1aa0   :  { %v1487_v37 = vadd.f32 %v1485_v12, %v1477_v58  ;;  %v1176_v58 = vadd.f32 %v3013_v6, %v3043_v57 }
0x1aa2   :  { %2649 = vtanh.f32 %v1487_v37 }
0x1aac   :  { %v2650_v14 = vpop.eup %2649 }
0x1aad   :  { %1490 = vrot.lane.b32.xlu0 %v2650_v14, %s2721_s16 }
0x1b1f   :  { %v1491_v15 = vpop.permute.xlu0 %1490 }
0x1b20   :  { %v1493_v16 = vmul.f32 %v2648_v13, %v1491_v15 }
0x1b22   :  { %1495 = vrot.lane.b32.xlu1 %v1493_v16, %s2722_s3 }
0x1b94   :  { %v1496_v17 = vpop.permute.xlu1 %1495 }
0x1b95   :  { %1498 = vst.msk [vmem:[#allocation3 + $0x10] sm:$0xff] %vm207_vm2, %v1496_v17  ;;  %2405 = vmatmul.mubr.msk.f32.vlgmr.msra.gmra.mrb[14].mxu1 %vm207_vm2, %v1496_v17 }
0x1b96   :  { %2539 = vmatpush3.bf16.msra.mxu1 %v2983_v51  ;;  %2426 = vmatprep.mubr.msk.f32.mxu1 %vm2719_vm0, %v2720_v2 }
0x1b97   :  { %2540 = vmatprep.subr.bf16.mxu1 %v2718_v1 }
0x1b9a   :  { %2542 = vmatpush3.bf16.msra.mxu1 %v2987_v54 }
0x1b9b   :  { %2549 = vmatprep.subr.bf16.mxu1 %v2718_v1 }
0x1c68   :  { %v1568_v19 = vpop.f32.mrb[14].mxu1 }
0x1c69   :  { %v1572_v20 = vadd.f32 %v1568_v19, %v1161_v18  ;;  %v2406_v21 = vpop.f32.mrb[15].mxu1 }
0x1c6b   :  { %2651 = vtanh.f32 %v1572_v20  ;;  %v2129_v23 = vmul.f32 -1.442695, %v1572_v20 }
0x1c6d   :  { %2653 = vpow2.f32 %v2129_v23 }
0x1c75   :  { %v2652_v22 = vpop.eup %2651 }
0x1c76   :  { %1582 = vrot.lane.b32.xlu0 %v2652_v22, %s2721_s16 }
0x1c77   :  { %v2654_v24 = vpop.eup %2653 }
0x1c78   :  { %v1576_v25 = vadd.f32 1.0, %v2654_v24 }
0x1c7a   :  { %2655 = vrcp.f32 %v1576_v25 }
0x1c84   :  { %v2656_v26 = vpop.eup %2655 }
0x1c85   :  { %v1580_v29 = vmul.f32 %v2656_v26, %v1487_v37 }
0x1ce8   :  { %v1583_v27 = vpop.permute.xlu0 %1582 }
0x1ce9   :  { %v1585_v28 = vmul.f32 %v2656_v26, %v1583_v27 }
0x1ceb   :  { %1587 = vrot.lane.b32.xlu1 %v1585_v28, %s2722_s3  ;;  %v1181_v28 = vadd.f32 %v3041_v55, %v3013_v6 }
0x1d5d   :  { %v1588_v30 = vpop.permute.xlu1 %1587 }
0x1d5e   :  { %v1590_v35 = vadd.f32 %v1588_v30, %v1580_v29 }
0x1d60   :  { %2657 = vtanh.f32 %v1590_v35 }
0x1d6a   :  { %v2658_v31 = vpop.eup %2657 }
0x1d6b   :  { %1593 = vrot.lane.b32.xlu0 %v2658_v31, %s2721_s16 }
0x1ddd   :  { %v1594_v32 = vpop.permute.xlu0 %1593 }
0x1dde   :  { %v1596_v34 = vmul.f32 %v2656_v26, %v1594_v32 }
0x1de0   :  { %1598 = vrot.lane.b32.xlu1 %v1596_v34, %s2722_s3 }
0x1e52   :  { %v1599_v36 = vpop.permute.xlu1 %1598 }
0x1e53   :  { %1601 = vst.msk [vmem:[#allocation3 + $0x18] sm:$0xff] %vm207_vm2, %v1599_v36  ;;  %2416 = vmatmul.mubr.msk.f32.vlgmr.msra.gmra.mrb[24].mxu0 %vm207_vm2, %v1599_v36 }
0x1e54   :  { %2545 = vmatpush3.bf16.msra.mxu0 %v2983_v51  ;;  %2437 = vmatprep.mubr.msk.f32.mxu0 %vm2719_vm0, %v2720_v2 }
0x1e55   :  { %2546 = vmatprep.subr.bf16.mxu0 %v2718_v1 }
0x1e58   :  { %2548 = vmatpush3.bf16.msra.mxu0 %v2987_v54 }
0x1f26   :  { %v1671_v61 = vpop.f32.mrb[24].mxu0 }
0x1f27   :  { %v1675_v41 = vadd.f32 %v1671_v61, %v1166_v40  ;;  %v2417_v42 = vpop.f32.mrb[25].mxu0 }
0x1f29   :  { %2659 = vtanh.f32 %v1675_v41  ;;  %v2131_v44 = vmul.f32 -1.442695, %v1675_v41 }
0x1f2b   :  { %2661 = vpow2.f32 %v2131_v44  ;;  %v2014_v44 = vld [vmem:[#allocation3] sm:$0xff] }
0x1f33   :  { %v2660_v43 = vpop.eup %2659 }
0x1f34   :  { %1685 = vrot.lane.b32.xlu0 %v2660_v43, %s2721_s16 }
0x1f35   :  { %v2662_v45 = vpop.eup %2661 }
0x1f36   :  { %v1679_v46 = vadd.f32 1.0, %v2662_v45  ;;  %v2138_v45 = vld [vmem:[%s3168_s7] ss:$0 sm:$0xff] }
0x1f38   :  { %2663 = vrcp.f32 %v1679_v46  ;;  %v2029_v46 = vmul.f32 %v2138_v45, %v2014_v44 }
0x1f42   :  { %v2664_v33 = vpop.eup %2663 }
0x1f43   :  { %v1683_v49 = vmul.f32 %v2664_v33, %v1590_v35 }
0x1fa6   :  { %v1686_v47 = vpop.permute.xlu0 %1685 }
0x1fa7   :  { %v1688_v48 = vmul.f32 %v2664_v33, %v1686_v47  ;;  %v2037_v47 = vsel %vm207_vm2, %v2029_v46, 0.0 }
0x1fa9   :  { %1690 = vrot.lane.b32.xlu1 %v1688_v48, %s2722_s3 }
0x201b   :  { %v1691_v50 = vpop.permute.xlu1 %1690 }
0x201c   :  { %v1693_v39 = vadd.f32 %v1691_v50, %v1683_v49  ;;  %v2017_v49 = vld [vmem:[#allocation3 + $0x18] sm:$0xff] }
0x201e   :  { %2665 = vtanh.f32 %v1693_v39 }
0x2028   :  { %v2666_v52 = vpop.eup %2665 }
0x2029   :  { %1696 = vrot.lane.b32.xlu0 %v2666_v52, %s2721_s16 }
0x209b   :  { %v1697_v53 = vpop.permute.xlu0 %1696 }
0x209c   :  { %v1699_v56 = vmul.f32 %v2664_v33, %v1697_v53  ;;  %v2016_v33 = vld [vmem:[#allocation3 + $0x10] sm:$0xff] }
0x209d   :  { %v2031_v48 = vmul.f32 %v2138_v45, %v2016_v33 }
0x209e   :  { %1701 = vrot.lane.b32.xlu1 %v1699_v56, %s2722_s3 }
0x209f   :  { %v2043_v50 = vsel %vm207_vm2, %v2031_v48, 0.0 }
0x2110   :  { %v1702_v59 = vpop.permute.xlu1 %1701 }
0x2111   :  { %1704 = vst.msk [vmem:[#allocation3 + $0x20] sm:$0xff] %vm207_vm2, %v1702_v59  ;;  %2427 = vmatmul.mubr.msk.f32.vlgmr.msra.gmra.mrb[16].mxu1 %vm207_vm2, %v1702_v59 }
0x2112   :  { %2551 = vmatpush3.bf16.msra.mxu1 %v2983_v51  ;;  %2448 = vmatprep.mubr.msk.f32.mxu1 %vm2719_vm0, %v2720_v2 }
0x2113   :  { %2552 = vmatprep.subr.bf16.mxu1 %v2718_v1 }
0x2116   :  { %2554 = vmatpush3.bf16.msra.mxu1 %v2987_v54 }
0x21e4   :  { %v1774_v63 = vpop.f32.mrb[16].mxu1 }
0x21e5   :  { %v1778_v0 = vadd.f32 %v1774_v63, %v1171_v62  ;;  %v2428_v3 = vpop.f32.mrb[17].mxu1 }
0x21e7   :  { %2667 = vtanh.f32 %v1778_v0  ;;  %v2133_v5 = vmul.f32 -1.442695, %v1778_v0  ;;  %v2015_v0 = vld [vmem:[#allocation3 + $0x8] sm:$0xff] }
0x21e8   :  { %v2030_v3 = vmul.f32 %v2138_v45, %v2015_v0 }
0x21e9   :  { %2669 = vpow2.f32 %v2133_v5 }
0x21ea   :  { %v2040_v5 = vsel %vm207_vm2, %v2030_v3, 0.0 }
0x21f1   :  { %v2668_v4 = vpop.eup %2667 }
0x21f2   :  { %1788 = vrot.lane.b32.xlu0 %v2668_v4, %s2721_s16  ;;  %v2018_v4 = vld [vmem:[#allocation3 + $0x20] sm:$0xff] }
0x21f3   :  { %v2670_v51 = vpop.eup %2669 }
0x21f4   :  { %v1782_v7 = vadd.f32 1.0, %v2670_v51  ;;  %v2033_v51 = vmul.f32 %v2138_v45, %v2018_v4 }
0x21f6   :  { %2671 = vrcp.f32 %v1782_v7 }
0x2200   :  { %v2672_v2 = vpop.eup %2671 }
0x2201   :  { %v1786_v54 = vmul.f32 %v2672_v2, %v1693_v39  ;;  %v2032_v39 = vmul.f32 %v2138_v45, %v2017_v49 }
0x2203   :  { %v2046_v53 = vsel %vm207_vm2, %v2032_v39, 0.0 }
0x2264   :  { %v1789_v8 = vpop.permute.xlu0 %1788 }
0x2265   :  { %v1791_v1 = vmul.f32 %v2672_v2, %v1789_v8 }
0x2267   :  { %1793 = vrot.lane.b32.xlu1 %v1791_v1, %s2722_s3 }
0x22d9   :  { %v1794_v11 = vpop.permute.xlu1 %1793 }
0x22da   :  { %v1796_v38 = vadd.f32 %v1794_v11, %v1786_v54  ;;  %v2139_v54 = vld [vmem:[#allocation4] ss:$0 sm:$0xff] }
0x22dc   :  { %2673 = vtanh.f32 %v1796_v38 }
0x22e6   :  { %v2674_v9 = vpop.eup %2673 }
0x22e7   :  { %1799 = vrot.lane.b32.xlu0 %v2674_v9, %s2721_s16 }
0x2359   :  { %v1800_v13 = vpop.permute.xlu0 %1799 }
0x235a   :  { %v1802_v60 = vmul.f32 %v2672_v2, %v1800_v13  ;;  %v2049_v2 = vsel %vm207_vm2, %v2033_v51, 0.0 }
0x235c   :  { %1804 = vrot.lane.b32.xlu1 %v1802_v60, %s2722_s3 }
0x23ce   :  { %v1805_v10 = vpop.permute.xlu1 %1804 }
0x23cf   :  { %1807 = vst.msk [vmem:[#allocation3 + $0x28] sm:$0xff] %vm207_vm2, %v1805_v10  ;;  %2438 = vmatmul.mubr.msk.f32.vlgmr.msra.gmra.mrb[26].mxu0 %vm207_vm2, %v1805_v10 }
0x23d6   :  { %v2019_v52 = vld [vmem:[#allocation3 + $0x28] sm:$0xff] }
0x23d7   :  { %v2034_v56 = vmul.f32 %v2138_v45, %v2019_v52 }
0x23d9   :  { %v2052_v59 = vsel %vm207_vm2, %v2034_v56, 0.0 }
0x24a2   :  { %v1877_v12 = vpop.f32.mrb[26].mxu0 }
0x24a3   :  { %v1881_v37 = vadd.f32 %v1877_v12, %v1176_v58  ;;  %v2439_v14 = vpop.f32.mrb[27].mxu0 }
0x24a5   :  { %2675 = vtanh.f32 %v1881_v37  ;;  %v2135_v16 = vmul.f32 -1.442695, %v1881_v37 }
0x24a7   :  { %2677 = vpow2.f32 %v2135_v16 }
0x24af   :  { %v2676_v15 = vpop.eup %2675 }
0x24b0   :  { %1891 = vrot.lane.b32.xlu0 %v2676_v15, %s2721_s16 }
0x24b1   :  { %v2678_v17 = vpop.eup %2677 }
0x24b2   :  { %v1885_v18 = vadd.f32 1.0, %v2678_v17 }
0x24b4   :  { %2679 = vrcp.f32 %v1885_v18 }
0x24be   :  { %v2680_v19 = vpop.eup %2679 }
0x24bf   :  { %v1889_v22 = vmul.f32 %v2680_v19, %v1796_v38 }
0x2522   :  { %v1892_v20 = vpop.permute.xlu0 %1891 }
0x2523   :  { %v1894_v21 = vmul.f32 %v2680_v19, %v1892_v20 }
0x2525   :  { %1896 = vrot.lane.b32.xlu1 %v1894_v21, %s2722_s3 }
0x2597   :  { %v1897_v23 = vpop.permute.xlu1 %1896 }
0x2598   :  { %v1899_v57 = vadd.f32 %v1897_v23, %v1889_v22 }
0x259a   :  { %2681 = vtanh.f32 %v1899_v57 }
0x25a4   :  { %v2682_v24 = vpop.eup %2681 }
0x25a5   :  { %1902 = vrot.lane.b32.xlu0 %v2682_v24, %s2721_s16 }
0x2617   :  { %v1903_v25 = vpop.permute.xlu0 %1902 }
0x2618   :  { %v1905_v26 = vmul.f32 %v2680_v19, %v1903_v25 }
0x261a   :  { %1907 = vrot.lane.b32.xlu1 %v1905_v26, %s2722_s3 }
0x268c   :  { %v1908_v27 = vpop.permute.xlu1 %1907 }
0x268d   :  { %1910 = vst.msk [vmem:[#allocation3 + $0x30] sm:$0xff] %vm207_vm2, %v1908_v27  ;;  %2449 = vmatmul.mubr.msk.f32.vlgmr.msra.gmra.mrb[18].mxu1 %vm207_vm2, %v1908_v27 }
0x2694   :  { %v2020_v7 = vld [vmem:[#allocation3 + $0x30] sm:$0xff] }
0x2695   :  { %v2035_v8 = vmul.f32 %v2138_v45, %v2020_v7 }
0x2697   :  { %v2055_v1 = vsel %vm207_vm2, %v2035_v8, 0.0 }
0x2760   :  { %v1980_v29 = vpop.f32.mrb[18].mxu1 }
0x2761   :  { %v1984_v30 = vadd.f32 %v1980_v29, %v1181_v28  ;;  %v2450_v35 = vpop.f32.mrb[19].mxu1 }
0x2763   :  { %2683 = vtanh.f32 %v1984_v30  ;;  %v2137_v32 = vmul.f32 -1.442695, %v1984_v30 }
0x2765   :  { %2685 = vpow2.f32 %v2137_v32 }
0x276d   :  { %v2684_v31 = vpop.eup %2683 }
0x276e   :  { %1994 = vrot.lane.b32.xlu0 %v2684_v31, %s2721_s16 }
0x276f   :  { %v2686_v34 = vpop.eup %2685 }
0x2770   :  { %v1988_v36 = vadd.f32 1.0, %v2686_v34 }
0x2772   :  { %2687 = vrcp.f32 %v1988_v36 }
0x277c   :  { %v2688_v40 = vpop.eup %2687 }
0x277d   :  { %v1992_v42 = vmul.f32 %v2688_v40, %v1899_v57 }
0x27e0   :  { %v1995_v61 = vpop.permute.xlu0 %1994 }
0x27e1   :  { %v1997_v41 = vmul.f32 %v2688_v40, %v1995_v61 }
0x27e3   :  { %1999 = vrot.lane.b32.xlu1 %v1997_v41, %s2722_s3 }
0x2855   :  { %v2000_v43 = vpop.permute.xlu1 %1999 }
0x2856   :  { %v2002_v6 = vadd.f32 %v2000_v43, %v1992_v42 }
0x2858   :  { %2689 = vtanh.f32 %v2002_v6 }
0x2862   :  { %v2690_v55 = vpop.eup %2689 }
0x2863   :  { %2005 = vrot.lane.b32.xlu0 %v2690_v55, %s2721_s16 }
0x2882   :  { %2038 = vadd.xlane.f32.xlu0 %v2037_v47 }
0x2886   :  { %2044 = vadd.xlane.f32.xlu0 %v2043_v50 }
0x288a   :  { %2047 = vadd.xlane.f32.xlu0 %v2046_v53 }
0x288e   :  { %2053 = vadd.xlane.f32.xlu0 %v2052_v59 }
0x28d5   :  { %v2006_v62 = vpop.permute.xlu0 %2005 }
0x28d6   :  { %v2008_v63 = vmul.f32 %v2688_v40, %v2006_v62 }
0x28d8   :  { %2010 = vrot.lane.b32.xlu1 %v2008_v63, %s2722_s3 }
0x28fc   :  { %2041 = vadd.xlane.f32.xlu1 %v2040_v5 }
0x2900   :  { %2050 = vadd.xlane.f32.xlu1 %v2049_v2 }
0x2904   :  { %2056 = vadd.xlane.f32.xlu1 %v2055_v1 }
0x290f   :  { %v2039_v11 = vpop.xlane.xlu0 %2038 }
0x2910   :  { %v2068_v38 = vadd.f32 %v2139_v54, %v2039_v11 }
0x2912   :  { %2077 = vst.msk [vmem:[%s3170_s9] sm:$0xff] %vm2076_vm3, %v2068_v38 }
0x2913   :  { %v2045_v9 = vpop.xlane.xlu0 %2044 }
0x2914   :  { %v2070_v13 = vadd.f32 %v2139_v54, %v2045_v9 }
0x2916   :  { %2079 = vst.msk [vmem:[%s3170_s9 + $0x10] sm:$0xff] %vm2076_vm3, %v2070_v13 }
0x2917   :  { %v2048_v60 = vpop.xlane.xlu0 %2047 }
0x2918   :  { %v2071_v10 = vadd.f32 %v2139_v54, %v2048_v60 }
0x291a   :  { %2080 = vst.msk [vmem:[%s3170_s9 + $0x18] sm:$0xff] %vm2076_vm3, %v2071_v10 }
0x291b   :  { %v2054_v58 = vpop.xlane.xlu0 %2053 }
0x291c   :  { %v2073_v12 = vadd.f32 %v2139_v54, %v2054_v58 }
0x291e   :  { %2082 = vst.msk [vmem:[%s3170_s9 + $0x28] sm:$0xff] %vm2076_vm3, %v2073_v12 }
0x294a   :  { %v2011_v37 = vpop.permute.xlu1 %2010 }
0x294b   :  { %2013 = vst.msk [vmem:[#allocation3 + $0x38] sm:$0xff] %vm207_vm2, %v2011_v37 }
0x2952   :  { %v2021_v14 = vld [vmem:[#allocation3 + $0x38] sm:$0xff] }
0x2953   :  { %v2036_v15 = vmul.f32 %v2138_v45, %v2021_v14 }
0x2955   :  { %v2058_v16 = vsel %vm207_vm2, %v2036_v15, 0.0 }
0x2956   :  { %2059 = vadd.xlane.f32.xlu0 %v2058_v16 }
0x2989   :  { %v2042_v17 = vpop.xlane.xlu1 %2041 }
0x298a   :  { %v2069_v18 = vadd.f32 %v2139_v54, %v2042_v17 }
0x298c   :  { %2078 = vst.msk [vmem:[%s3170_s9 + $0x8] sm:$0xff] %vm2076_vm3, %v2069_v18 }
0x298d   :  { %v2051_v19 = vpop.xlane.xlu1 %2050 }
0x298e   :  { %v2072_v20 = vadd.f32 %v2139_v54, %v2051_v19 }
0x2990   :  { %2081 = vst.msk [vmem:[%s3170_s9 + $0x20] sm:$0xff] %vm2076_vm3, %v2072_v20 }
0x2991   :  { %v2057_v21 = vpop.xlane.xlu1 %2056 }
0x2992   :  { %v2074_v22 = vadd.f32 %v2139_v54, %v2057_v21 }
0x2994   :  { %2083 = vst.msk [vmem:[%s3170_s9 + $0x30] sm:$0xff] %vm2076_vm3, %v2074_v22 }
0x29e3   :  { %v2060_v23 = vpop.xlane.xlu0 %2059 }
0x29e4   :  { %v2075_v57 = vadd.f32 %v2139_v54, %v2060_v23 }
0x29e6   :  { %2084 = vst.msk [vmem:[%s3170_s9 + $0x38] sm:$0xff] %vm2076_vm3, %v2075_v57 }
0x29e7   :  { %2089 = vsyncpa [#allocation6], 1 }

</bundles_post_ra>
